<compile_context>
chip_gen: v7x
topology: tpu7x:2x2x1
jax: 0.10.0
libtpu: 0.0.40
codegen_flags: <defaults>
</compile_context>

<pallas_src>
import functools
import math

import numpy as np

import jax
import jax.numpy as jnp
from jax import lax
from jax.experimental import pallas as pl
from jax.experimental.pallas import tpu as pltpu

_LOG_2PI = math.log(2.0 * math.pi)


def _round_up(x, m):
    return ((x + m - 1) // m) * m


def _huber(d):  # delta = 1.0 (F.huber_loss default)
    a = jnp.abs(d)
    return jnp.where(a < 1.0, 0.5 * d * d, a - 0.5)


def _bf16_transcendentals_ok():
    """bf16 EUP exists on v6e / v7x only; keep f32 elsewhere (v5e has no bf16 EUP)."""
    try:
        kind = jax.devices()[0].device_kind.lower()
    except Exception:
        return False
    return any(s in kind for s in ("v6", "v7", "tpu7", "trillium", "ironwood"))


# ----------------------------------------------------------------------------
# Pallas kernel
# ----------------------------------------------------------------------------
def matcher_cost_kernel(logits_ref, present_ref, seg_ref, qp_ref, ep_ref,
                        cost_ref,
                        acc_mask, acc_dice, acc_nsum, acc_nnz, acc_tsum,
                        *, coefs, n_electrons, bf16_transc):
    """One (batch, P-tile) grid step: accumulate pixel reductions; finalize the
    (Qp, Ep) cost matrix on the last P tile.

    logits_ref / present_ref : (1, Qp, TP) bf16   P on lanes
    seg_ref                  : (1, TP, Ep) bf16   natural layout (P sublanes, E lanes);
                                                  lane `n_electrons` is an all-ones column
    qp_ref                   : (1, Qp, 8)  f32    [cls, px, py, L00, L10, L11, 0, 0]
    ep_ref                   : (1, 4, Ep)  f32    rows: tx, ty, sx, sy
    cost_ref                 : (1, Qp, Ep) f32    lane-dense output
    """
    k = pl.program_id(1)
    k_last = pl.num_programs(1) - 1
    f32 = jnp.float32
    bf16 = jnp.bfloat16

    @pl.when(k == 0)
    def _init():
        acc_mask[...] = jnp.zeros_like(acc_mask)
        acc_dice[...] = jnp.zeros_like(acc_dice)
        acc_nsum[...] = jnp.zeros_like(acc_nsum)
        acc_nnz[...] = jnp.zeros_like(acc_nnz)
        acc_tsum[...] = jnp.zeros_like(acc_tsum)

    x_b = logits_ref[0]                       # (Qp, TP) bf16
    m_b = present_ref[0]                      # (Qp, TP) bf16 {0,1}
    seg = seg_ref[0]                          # (TP, Ep) bf16, canonical (K, N) MXU operand

    x = x_b.astype(f32)
    m = m_b.astype(f32)

    # ---- mask (BCE-with-logits) cost:
    # pos - neg == -m*x exactly, so a single MXU dot plus a per-query row-sum
    # of neg covers the whole BCE cost.  The torch "pixels with predictions"
    # row selection is a no-op here because pos/neg are 0 wherever m == 0
    # (deviation only if softplus underflows, x >~ 100 -- intentional).
    if bf16_transc:
        lse = jnp.log(1.0 + jnp.exp(-jnp.abs(x_b))).astype(f32)   # EUP in bf16
    else:
        lse = jnp.log(1.0 + jnp.exp(-jnp.abs(x)))
    neg = m * (jnp.maximum(x, 0.0) + lse)                         # BCE(x, 0), masked

    targ = (seg != 0).astype(f32)                                 # (TP, Ep) binarized
    mask_lhs = (-(m * x)).astype(bf16)                            # (Qp, TP)
    acc_mask[...] += lax.dot_general(
        mask_lhs, targ.astype(bf16), (((1,), (0,)), ((), ())),
        preferred_element_type=f32)
    acc_nsum[...] += jnp.sum(neg, axis=1, keepdims=True)          # (Qp, 1)
    acc_nnz[...] += jnp.sum(targ, axis=0, keepdims=True)          # (1, Ep) nnz vector

    # ---- dice cost: sparse softmax over queries (sublane axis) per pixel
    xm = jnp.where(m > 0.0, x, f32(-1e30))
    col_max = jnp.max(xm, axis=0, keepdims=True)                  # (1, TP)
    col_max = jnp.where(col_max > f32(-1e29), col_max, 0.0)
    if bf16_transc:
        exps = jnp.exp((xm - col_max).astype(bf16)).astype(f32)   # EUP in bf16
    else:
        exps = jnp.exp(xm - col_max)                              # exactly 0 where absent
    denom = jnp.sum(exps, axis=0, keepdims=True)                  # (1, TP)
    portions = exps * pl.reciprocal(denom + 1e-20, approx=True)   # (Qp, TP)

    # Lane column `n_electrons` of seg is all ones, so this one dot yields both
    # the dice numerator (columns :E) and pred_sum (column E) -- no lane reduce.
    acc_dice[...] += lax.dot_general(
        portions.astype(bf16), seg, (((1,), (0,)), ((), ())),
        preferred_element_type=f32)
    acc_tsum[...] += jnp.sum(seg.astype(f32), axis=0, keepdims=True)   # (1, Ep) true_sum

    # ---- finalize on the last P tile (runs once per batch element)
    @pl.when(k == k_last)
    def _finalize():
        qp = qp_ref[0]                        # (Qp, 8)
        ep = ep_ref[0]                        # (4, Ep)
        cls = qp[:, 0:1]
        px, py = qp[:, 1:2], qp[:, 2:3]
        a, b, c = qp[:, 3:4], qp[:, 4:5], qp[:, 5:6]
        tx, ty = ep[0:1, :], ep[1:2, :]
        sx, sy = ep[2:3, :], ep[3:4, :]

        # class cost: BCE(logit, 1) = softplus(-logit), broadcast over electrons
        class_cost = jnp.maximum(-cls, 0.0) + jnp.log(1.0 + jnp.exp(-jnp.abs(cls)))

        e_pad = acc_dice.shape[1]
        lane = lax.broadcasted_iota(jnp.int32, (1, e_pad), 1)
        nnz = jnp.sum(jnp.where(lane < n_electrons, acc_nnz[...], 0.0),
                      axis=1, keepdims=True)                      # mask out ones column
        nnz = jnp.maximum(nnz, 1.0)                               # (1, 1)
        mask_cost = (acc_mask[...] + acc_nsum[...]) / nnz         # exact division

        dice_full = acc_dice[...]                                 # (Qp, Ep)
        lane_q = lax.broadcasted_iota(jnp.int32, dice_full.shape, 1)
        pred_sum = jnp.sum(jnp.where(lane_q == n_electrons, dice_full, 0.0),
                           axis=1, keepdims=True)                 # (Qp, 1)
        den = pred_sum + acc_tsum[...] + 1.0
        dice_cost = 1.0 - (2.0 * dice_full + 1.0) / den           # exact division

        dx, dy = px - tx, py - ty                                 # (Qp, Ep)
        dist_cost = 0.5 * (_huber(dx) + _huber(dy))

        mdx = (tx - px) * sx
        mdy = (ty - py) * sy
        z0 = mdx / a                                              # exact division
        z1 = (mdy - b * z0) / c
        logp = -0.5 * (z0 * z0 + z1 * z1) - jnp.log(a * c) - f32(_LOG_2PI)
        nll_cost = -logp
        lik_cost = 1.0 - jnp.exp(logp)

        cost_ref[0] = (coefs["class"] * class_cost
                       + coefs["mask"] * mask_cost
                       + coefs["dice"] * dice_cost
                       + coefs["dist"] * dist_cost
                       + coefs["nll"] * nll_cost
                       + coefs["likelihood"] * lik_cost).astype(f32)


# ----------------------------------------------------------------------------
# wrapper: layout plumbing (pad, pack small params) + pallas_call
# ----------------------------------------------------------------------------
def _derive_tile_p(P, q_pad, e_pad, vmem_budget_bytes):
    # Per-unit-tile_p bytes: double-buffered bf16 logits + present (Q side) and seg (E side).
    per = 8 * q_pad + 4 * e_pad
    # Resident f32 accumulators + (double-buffered) f32 output block.
    fixed = 16 * q_pad * e_pad
    avail = max(vmem_budget_bytes - fixed, per * 128)
    tp = (avail // per) // 128 * 128
    return int(max(128, min(tp, _round_up(P, 128))))


def hungarian_matcher_costs(mask_logits, mask_present, segmap, class_logits,
                            pred_pos, pred_chol, true_pos, image_size_xy,
                            coefs, *, tile_p=None, vmem_budget_bytes=40 << 20):
    B, P, Q = mask_logits.shape
    E = segmap.shape[-1]

    q_pad = _round_up(Q, 8)
    e_pad = _round_up(E + 1, 128)      # +1: lane E of seg is an all-ones column (pred_sum via MXU)

    if tile_p is None:
        tile_p = _derive_tile_p(P, q_pad, e_pad, vmem_budget_bytes)
    tile_p = max(128, _round_up(min(tile_p, _round_up(P, 128)), 128))
    p_pad = _round_up(P, tile_p)
    num_pt = p_pad // tile_p

    # (B, Q, P) bf16, P lane-dense.
    # TODO(synk): if the upstream producer can emit (B, Q, P) bf16 directly, drop
    # this transpose+pad+cast prepass entirely (matters most on v5e HBM bandwidth).
    def qp_lane_dense(xv):
        xv = jnp.transpose(xv, (0, 2, 1)).astype(jnp.bfloat16)
        return jnp.pad(xv, ((0, 0), (0, q_pad - Q), (0, p_pad - P)))

    logits_t = qp_lane_dense(mask_logits)
    present_t = qp_lane_dense(mask_present)
    # TODO(synk): mask_present could be stored int8 (halves its HBM bytes on v5e) but
    # requires 32-sublane-aligned q_pad; skipped here since Q is tiny in this config.

    # segmap keeps its natural [B, P, E] layout: no transpose, canonical (K, N) dot operand.
    seg_t = jnp.pad(segmap.astype(jnp.bfloat16),
                    ((0, 0), (0, p_pad - P), (0, e_pad - E)))
    seg_t = seg_t.at[:, :, E].set(jnp.bfloat16(1.0))   # ones column -> pred_sum via the dice dot

    # Small per-query params merged into a single (B, Qp, 8) block (one DMA).
    def padq(xv, fill=0.0):
        return jnp.pad(xv.astype(jnp.float32),
                       ((0, 0), (0, q_pad - Q), (0, 0)), constant_values=fill)
    qparams = jnp.concatenate(
        [padq(class_logits), padq(pred_pos),
         padq(pred_chol[..., 0:1], 1.0), padq(pred_chol[..., 1:2]),
         padq(pred_chol[..., 2:3], 1.0),
         jnp.zeros((B, q_pad, 2), jnp.float32)], axis=-1)

    # Small per-electron params merged into a single (B, 4, Ep) block.
    tx = jnp.pad(true_pos[..., 0].astype(jnp.float32), ((0, 0), (0, e_pad - E)))
    ty = jnp.pad(true_pos[..., 1].astype(jnp.float32), ((0, 0), (0, e_pad - E)))
    sx = jnp.broadcast_to(image_size_xy[:, 0:1].astype(jnp.float32), (B, e_pad))
    sy = jnp.broadcast_to(image_size_xy[:, 1:2].astype(jnp.float32), (B, e_pad))
    eparams = jnp.stack([tx, ty, sx, sy], axis=1)

    kernel = functools.partial(
        matcher_cost_kernel,
        coefs={k: float(v) for k, v in coefs.items()},
        n_electrons=E,
        bf16_transc=_bf16_transcendentals_ok())

    bmap_qp = lambda b, k: (b, 0, k)    # Q-side arrays tiled over P (lanes)
    bmap_seg = lambda b, k: (b, k, 0)   # seg tiled over P (sublanes), natural layout
    bmap_out = lambda b, k: (b, 0, 0)   # resident across the P reduction axis

    # VMEM working-set estimate -> scoped limit safe for v7x (64 MiB physical VMEM).
    est_bytes = 16 * q_pad * e_pad + tile_p * (8 * q_pad + 4 * e_pad)
    vmem_limit = int(min(max(32 << 20, est_bytes * 5 // 4 + (2 << 20)), 56 << 20))

    # TODO(synk): on v7x, if B can be 1 the single "parallel" axis idles one TensorCore;
    # splitting Q would require a two-pass softmax (denominator spans all queries).
    cost_padded = pl.pallas_call(
        kernel,
        out_shape=jax.ShapeDtypeStruct((B, q_pad, e_pad), jnp.float32),
        grid_spec=pltpu.PrefetchScalarGridSpec(
            num_scalar_prefetch=0,
            grid=(B, num_pt),
            in_specs=[
                pl.BlockSpec((1, q_pad, tile_p), bmap_qp),    # mask logits
                pl.BlockSpec((1, q_pad, tile_p), bmap_qp),    # sparsity pattern
                pl.BlockSpec((1, tile_p, e_pad), bmap_seg),   # segmentation map (natural layout)
                pl.BlockSpec((1, q_pad, 8), bmap_out),        # packed per-query params
                pl.BlockSpec((1, 4, e_pad), bmap_out),        # packed per-electron params
            ],
            out_specs=pl.BlockSpec((1, q_pad, e_pad), bmap_out),
            scratch_shapes=[
                pltpu.VMEM((q_pad, e_pad), jnp.float32),      # BCE dot accumulator
                pltpu.VMEM((q_pad, e_pad), jnp.float32),      # dice numerator (+ pred_sum column)
                pltpu.VMEM((q_pad, 1), jnp.float32),          # sum of neg over pixels
                pltpu.VMEM((1, e_pad), jnp.float32),          # nnz vector of binarized segmap
                pltpu.VMEM((1, e_pad), jnp.float32),          # true portion sums
            ]),
        compiler_params=pltpu.CompilerParams(
            dimension_semantics=("parallel", "arbitrary"),
            vmem_limit_bytes=vmem_limit),
    )(logits_t, present_t, seg_t, qparams, eparams)

    return cost_padded[:, :Q, :E]


# ----------------------------------------------------------------------------
# pure-JAX reference (natural layout, f32, HIGHEST-precision dots, torch-faithful)
# ----------------------------------------------------------------------------
def _reference_costs(mask_logits, mask_present, segmap, class_logits, pred_pos,
                     pred_chol, true_pos, image_size_xy, coefs):
    def softplus(v):
        return jnp.maximum(v, 0.0) + jnp.log(1.0 + jnp.exp(-jnp.abs(v)))

    hp = lax.Precision.HIGHEST

    def one(x, m, seg, cls, ppos, chol, tpos, imsz):
        pos = m * softplus(-x)                                     # (P, Q)
        neg = m * softplus(x)
        targ = (seg != 0.0).astype(jnp.float32)                    # (P, E)
        sel = (jnp.sum(pos, axis=1, keepdims=True) != 0.0).astype(jnp.float32)
        pos_loss = jnp.matmul((pos * sel).T, targ * sel, precision=hp)
        neg_loss = (jnp.sum(neg * sel, axis=0, keepdims=True).T
                    - jnp.matmul((neg * sel).T, targ * sel, precision=hp))
        nnz = jnp.maximum(jnp.sum(targ), 1.0)
        mask_cost = (pos_loss + neg_loss) / nnz

        xm = jnp.where(m > 0.0, x, -jnp.inf)
        row_max = jnp.max(xm, axis=1, keepdims=True)
        row_max = jnp.where(jnp.isfinite(row_max), row_max, 0.0)
        exps = jnp.where(m > 0.0, jnp.exp(x - row_max), 0.0)
        denom = jnp.sum(exps, axis=1, keepdims=True)
        portions = jnp.where(denom > 0.0, exps / jnp.maximum(denom, 1e-30), 0.0)
        num = 2.0 * jnp.matmul(portions.T, seg, precision=hp)      # (Q, E)
        pred_sum = jnp.sum(portions, axis=0)[:, None]
        true_sum = jnp.sum(seg, axis=0)[None, :]
        dice_cost = 1.0 - (num + 1.0) / (pred_sum + true_sum + 1.0)

        class_cost = softplus(-cls)                                # (Q, 1)

        px, py = ppos[:, 0:1], ppos[:, 1:2]
        tx, ty = tpos[:, 0][None, :], tpos[:, 1][None, :]
        dist_cost = 0.5 * (_huber(px - tx) + _huber(py - ty))

        a, b, c = chol[:, 0:1], chol[:, 1:2], chol[:, 2:3]
        sx, sy = imsz[0], imsz[1]
        mdx = (tx - px) * sx
        mdy = (ty - py) * sy
        z0 = mdx / a
        z1 = (mdy - b * z0) / c
        logp = (-0.5 * (z0 * z0 + z1 * z1) - jnp.log(a) - jnp.log(c)
                - jnp.float32(_LOG_2PI))
        nll_cost = -logp
        lik_cost = 1.0 - jnp.exp(logp)

        return (coefs["class"] * class_cost + coefs["mask"] * mask_cost
                + coefs["dice"] * dice_cost + coefs["dist"] * dist_cost
                + coefs["nll"] * nll_cost + coefs["likelihood"] * lik_cost)

    B = mask_logits.shape[0]
    return jnp.stack([one(mask_logits[b], mask_present[b], segmap[b],
                          class_logits[b], pred_pos[b], pred_chol[b],
                          true_pos[b], image_size_xy[b]) for b in range(B)])


# ----------------------------------------------------------------------------
# Host-side Hungarian assignment.
# TODO(synk): linear_sum_assignment is a sequential combinatorial algorithm;
# it runs on the host (numpy), not as a TPU kernel.
# ----------------------------------------------------------------------------
def _linear_sum_assignment(cost):
    cost = np.asarray(cost, dtype=np.float64)
    transposed = cost.shape[0] > cost.shape[1]
    C = cost.T if transposed else cost
    n, m = C.shape                    # n <= m
    INF = float("inf")
    u = [0.0] * (n + 1)
    v = [0.0] * (m + 1)
    p = [0] * (m + 1)
    way = [0] * (m + 1)
    for i in range(1, n + 1):
        p[0] = i
        j0 = 0
        minv = [INF] * (m + 1)
        used = [False] * (m + 1)
        while True:
            used[j0] = True
            i0 = p[j0]
            delta = INF
            j1 = 0
            for j in range(1, m + 1):
                if not used[j]:
                    cur = C[i0 - 1, j - 1] - u[i0] - v[j]
                    if cur < minv[j]:
                        minv[j] = cur
                        way[j] = j0
                    if minv[j] < delta:
                        delta = minv[j]
                        j1 = j
            for j in range(m + 1):
                if used[j]:
                    u[p[j]] += delta
                    v[j] -= delta
                else:
                    minv[j] -= delta
            j0 = j1
            if p[j0] == 0:
                break
        while True:
            j1 = way[j0]
            p[j0] = p[j1]
            j0 = j1
            if j0 == 0:
                break
    rows, cols = [], []
    for j in range(1, m + 1):
        if p[j] != 0:
            rows.append(p[j] - 1)
            cols.append(j - 1)
    rows = np.asarray(rows, dtype=np.int64)
    cols = np.asarray(cols, dtype=np.int64)
    if transposed:
        rows, cols = cols, rows
    order = np.argsort(rows)
    return rows[order], cols[order]


# ----------------------------------------------------------------------------
# main
# ----------------------------------------------------------------------------
if __name__ == "__main__":
    B, H, W, Q, E = 2, 16, 16, 16, 8
    P = H * W

    # deterministic MatcherConfig-style cost coefficients
    coefs = {"class": 1.0, "mask": 1.0, "dice": 1.0,
             "dist": 1.0, "nll": 0.5, "likelihood": 0.5}

    key = jax.random.PRNGKey(0)
    ks = jax.random.split(key, 10)

    mask_logits = jax.random.normal(ks[0], (B, P, Q), jnp.float32)
    mask_present = (jax.random.uniform(ks[1], (B, P, Q)) < 0.3).astype(jnp.float32)
    seg_vals = jax.random.uniform(ks[2], (B, P, E), jnp.float32)
    seg_mask = (jax.random.uniform(ks[3], (B, P, E)) < 0.1).astype(jnp.float32)
    segmap = seg_vals * seg_mask
    class_logits = jax.random.normal(ks[4], (B, Q, 1), jnp.float32)
    pred_pos = jax.random.uniform(ks[5], (B, Q, 2), jnp.float32)
    true_pos = jax.random.uniform(ks[6], (B, E, 2), jnp.float32)
    l00 = 1.0 + 0.5 * jax.random.uniform(ks[7], (B, Q, 1), jnp.float32)
    l10 = 0.3 * jax.random.normal(ks[8], (B, Q, 1), jnp.float32)
    l11 = 1.0 + 0.5 * jax.random.uniform(ks[9], (B, Q, 1), jnp.float32)
    pred_chol = jnp.concatenate([l00, l10, l11], axis=-1)   # (B, Q, 3)
    image_size_xy = jnp.broadcast_to(
        jnp.array([float(W), float(H)], jnp.float32), (B, 2))

    # TODO(synk): optional 'pred_boxes' branch (box L1 + GIoU costs) not implemented.
    # tile_p=128 here only forces >1 P tile to exercise the accumulation path at
    # this tiny test size; the shipped default derives tile_p from the VMEM budget.
    cost_fn = jax.jit(functools.partial(hungarian_matcher_costs,
                                        coefs=coefs, tile_p=128))
    cost = cost_fn(mask_logits, mask_present, segmap, class_logits, pred_pos,
                   pred_chol, true_pos, image_size_xy)
    cost = jax.block_until_ready(cost)

    ref = _reference_costs(mask_logits, mask_present, segmap, class_logits,
                           pred_pos, pred_chol, true_pos, image_size_xy, coefs)
    np.testing.assert_allclose(np.asarray(cost), np.asarray(ref),
                               rtol=2e-2, atol=2e-2)

    # Hungarian assignment per batch element (host glue)
    cost_np = np.asarray(cost)
    indices = []
    for b in range(B):
        ri, ci = _linear_sum_assignment(cost_np[b])
        indices.append(np.stack([ri, ci]))
    assert all(ind.shape == (2, min(Q, E)) for ind in indices)

    print("KERNEL_OK")
</pallas_src>

<mosaic_0001>
module attributes {stable_mosaic.version = 11 : i64} {
  func.func @matcher_cost_kernel(%arg0: i32, %arg1: i32, %arg2: memref<1x16x128xbf16, #tpu.memory_space<vmem>>, %arg3: memref<1x16x128xbf16, #tpu.memory_space<vmem>>, %arg4: memref<1x128x128xbf16, #tpu.memory_space<vmem>>, %arg5: memref<1x16x8xf32, #tpu.memory_space<vmem>>, %arg6: memref<1x4x128xf32, #tpu.memory_space<vmem>>, %arg7: memref<1x16x128xf32, #tpu.memory_space<vmem>>, %arg8: memref<16x128xf32, #tpu.memory_space<vmem>>, %arg9: memref<16x128xf32, #tpu.memory_space<vmem>>, %arg10: memref<16x1xf32, #tpu.memory_space<vmem>>, %arg11: memref<1x128xf32, #tpu.memory_space<vmem>>, %arg12: memref<1x128xf32, #tpu.memory_space<vmem>>) attributes {dimension_semantics = [#tpu.dimension_semantics<parallel>, #tpu.dimension_semantics<arbitrary>], iteration_bounds = array<i64: 2, 2>, scalar_prefetch = 0 : i64, scratch_operands = 5 : i64, tpu.core_type = #tpu.core_type<tc>, window_params = [{transform_indices = @transform_0, window_bounds = array<i64: 1, 16, 128>}, {transform_indices = @transform_1, window_bounds = array<i64: 1, 16, 128>}, {transform_indices = @transform_2, window_bounds = array<i64: 1, 128, 128>}, {transform_indices = @transform_3, window_bounds = array<i64: 1, 16, 8>}, {transform_indices = @transform_4, window_bounds = array<i64: 1, 4, 128>}, {transform_indices = @transform_5, window_bounds = array<i64: 1, 16, 128>}]} {
    %c0_i32 = arith.constant 0 : i32
    %0 = arith.cmpi eq, %arg1, %c0_i32 : i32
    %1 = arith.extui %0 : i1 to i32
    %c0_i32_0 = arith.constant 0 : i32
    %2 = arith.cmpi ne, %1, %c0_i32_0 : i32
    scf.if %2 {
      %cst_46 = arith.constant 0.000000e+00 : f32
      %79 = vector.broadcast %cst_46 : f32 to vector<16x128xf32>
      %c0_47 = arith.constant 0 : index
      %c0_48 = arith.constant 0 : index
      %80 = vector.load %arg8[%c0_47, %c0_48] : memref<16x128xf32, #tpu.memory_space<vmem>>, vector<16x128xf32>
      tpu.vector_store %arg8[%c0_47, %c0_48], %79 {strides = array<i32>} : memref<16x128xf32, #tpu.memory_space<vmem>>, vector<16x128xf32>,
      %cst_49 = arith.constant 0.000000e+00 : f32
      %81 = vector.broadcast %cst_49 : f32 to vector<16x128xf32>
      %c0_50 = arith.constant 0 : index
      %c0_51 = arith.constant 0 : index
      %82 = vector.load %arg9[%c0_50, %c0_51] : memref<16x128xf32, #tpu.memory_space<vmem>>, vector<16x128xf32>
      tpu.vector_store %arg9[%c0_50, %c0_51], %81 {strides = array<i32>} : memref<16x128xf32, #tpu.memory_space<vmem>>, vector<16x128xf32>,
      %cst_52 = arith.constant 0.000000e+00 : f32
      %83 = vector.broadcast %cst_52 : f32 to vector<16x1xf32>
      %c0_53 = arith.constant 0 : index
      %c0_54 = arith.constant 0 : index
      %84 = vector.load %arg10[%c0_53, %c0_54] : memref<16x1xf32, #tpu.memory_space<vmem>>, vector<16x1xf32>
      tpu.vector_store %arg10[%c0_53, %c0_54], %83 {strides = array<i32>} : memref<16x1xf32, #tpu.memory_space<vmem>>, vector<16x1xf32>,
      %cst_55 = arith.constant 0.000000e+00 : f32
      %85 = vector.broadcast %cst_55 : f32 to vector<1x128xf32>
      %c0_56 = arith.constant 0 : index
      %c0_57 = arith.constant 0 : index
      %86 = vector.load %arg11[%c0_56, %c0_57] : memref<1x128xf32, #tpu.memory_space<vmem>>, vector<1x128xf32>
      tpu.vector_store %arg11[%c0_56, %c0_57], %85 {strides = array<i32>} : memref<1x128xf32, #tpu.memory_space<vmem>>, vector<1x128xf32>,
      %cst_58 = arith.constant 0.000000e+00 : f32
      %87 = vector.broadcast %cst_58 : f32 to vector<1x128xf32>
      %c0_59 = arith.constant 0 : index
      %c0_60 = arith.constant 0 : index
      %88 = vector.load %arg12[%c0_59, %c0_60] : memref<1x128xf32, #tpu.memory_space<vmem>>, vector<1x128xf32>
      tpu.vector_store %arg12[%c0_59, %c0_60], %87 {strides = array<i32>} : memref<1x128xf32, #tpu.memory_space<vmem>>, vector<1x128xf32>,
    } else {
    }
    %c0 = arith.constant 0 : index
    %c0_1 = arith.constant 0 : index
    %c0_2 = arith.constant 0 : index
    %3 = vector.load %arg2[%c0, %c0_1, %c0_2] : memref<1x16x128xbf16, #tpu.memory_space<vmem>>, vector<1x16x128xbf16>
    %4 = vector.shape_cast %3 : vector<1x16x128xbf16> to vector<16x128xbf16>
    %c0_3 = arith.constant 0 : index
    %c0_4 = arith.constant 0 : index
    %c0_5 = arith.constant 0 : index
    %5 = vector.load %arg3[%c0_3, %c0_4, %c0_5] : memref<1x16x128xbf16, #tpu.memory_space<vmem>>, vector<1x16x128xbf16>
    %6 = vector.shape_cast %5 : vector<1x16x128xbf16> to vector<16x128xbf16>
    %c0_6 = arith.constant 0 : index
    %c0_7 = arith.constant 0 : index
    %c0_8 = arith.constant 0 : index
    %7 = vector.load %arg4[%c0_6, %c0_7, %c0_8] : memref<1x128x128xbf16, #tpu.memory_space<vmem>>, vector<1x128x128xbf16>
    %8 = vector.shape_cast %7 : vector<1x128x128xbf16> to vector<128x128xbf16>
    %9 = arith.extf %4 : vector<16x128xbf16> to vector<16x128xf32>
    %10 = arith.extf %6 : vector<16x128xbf16> to vector<16x128xf32>
    %11 = math.absf %9 : vector<16x128xf32>
    %cst = arith.constant 0.000000e+00 : f32
    %12 = vector.broadcast %cst : f32 to vector<16x128xf32>
    %13 = arith.subf %12, %11 : vector<16x128xf32>
    %14 = math.exp %13 : vector<16x128xf32>
    %cst_9 = arith.constant 1.000000e+00 : f32
    %15 = vector.broadcast %cst_9 : f32 to vector<16x128xf32>
    %16 = arith.addf %15, %14 : vector<16x128xf32>
    %17 = math.log %16 : vector<16x128xf32>
    %cst_10 = arith.constant 0.000000e+00 : f32
    %18 = vector.broadcast %cst_10 : f32 to vector<16x128xf32>
    %19 = arith.maximumf %9, %18 : vector<16x128xf32>
    %20 = arith.addf %19, %17 : vector<16x128xf32>
    %21 = arith.mulf %10, %20 : vector<16x128xf32>
    %cst_11 = arith.constant 0.000000e+00 : bf16
    %22 = vector.broadcast %cst_11 : bf16 to vector<128x128xbf16>
    %23 = arith.cmpf one, %8, %22 : vector<128x128xbf16>
    %24 = arith.extui %23 : vector<128x128xi1> to vector<128x128xi32>
    %25 = arith.sitofp %24 : vector<128x128xi32> to vector<128x128xf32>
    %26 = arith.mulf %10, %9 : vector<16x128xf32>
    %cst_12 = arith.constant 0.000000e+00 : f32
    %27 = vector.broadcast %cst_12 : f32 to vector<16x128xf32>
    %28 = arith.subf %27, %26 : vector<16x128xf32>
    %29 = arith.truncf %28 : vector<16x128xf32> to vector<16x128xbf16>
    %c0_13 = arith.constant 0 : index
    %c0_14 = arith.constant 0 : index
    %30 = vector.load %arg8[%c0_13, %c0_14] : memref<16x128xf32, #tpu.memory_space<vmem>>, vector<16x128xf32>
    %31 = arith.truncf %25 : vector<128x128xf32> to vector<128x128xbf16>
    %cst_15 = arith.constant dense<0.000000e+00> : vector<16x128xf32>
    %32 = tpu.matmul %29, %31, %cst_15 {dimension_numbers = #tpu.dot_dimension_numbers<[1], [0], [0], [1], [0, 0, 1, 1], [], []>} : vector<16x128xbf16>, vector<128x128xbf16>, vector<16x128xf32> -> vector<16x128xf32>
    %33 = arith.addf %30, %32 : vector<16x128xf32>
    %c0_16 = arith.constant 0 : index
    %c0_17 = arith.constant 0 : index
    %34 = vector.load %arg8[%c0_16, %c0_17] : memref<16x128xf32, #tpu.memory_space<vmem>>, vector<16x128xf32>
    tpu.vector_store %arg8[%c0_16, %c0_17], %33 {strides = array<i32>} : memref<16x128xf32, #tpu.memory_space<vmem>>, vector<16x128xf32>,
    %c0_18 = arith.constant 0 : index
    %c0_19 = arith.constant 0 : index
    %35 = vector.load %arg10[%c0_18, %c0_19] : memref<16x1xf32, #tpu.memory_space<vmem>>, vector<16x1xf32>
    %cst_20 = arith.constant dense<0.000000e+00> : vector<16xf32>
    %36 = vector.multi_reduction <add>, %21, %cst_20 [1] : vector<16x128xf32> to vector<16xf32>
    %37 = vector.shape_cast %36 : vector<16xf32> to vector<16x1xf32>
    %38 = arith.addf %35, %37 : vector<16x1xf32>
    %c0_21 = arith.constant 0 : index
    %c0_22 = arith.constant 0 : index
    %39 = vector.load %arg10[%c0_21, %c0_22] : memref<16x1xf32, #tpu.memory_space<vmem>>, vector<16x1xf32>
    tpu.vector_store %arg10[%c0_21, %c0_22], %38 {strides = array<i32>} : memref<16x1xf32, #tpu.memory_space<vmem>>, vector<16x1xf32>,
    %c0_23 = arith.constant 0 : index
    %c0_24 = arith.constant 0 : index
    %40 = vector.load %arg11[%c0_23, %c0_24] : memref<1x128xf32, #tpu.memory_space<vmem>>, vector<1x128xf32>
    %cst_25 = arith.constant dense<0.000000e+00> : vector<128xf32>
    %41 = vector.multi_reduction <add>, %25, %cst_25 [0] : vector<128x128xf32> to vector<128xf32>
    %42 = vector.shape_cast %41 : vector<128xf32> to vector<1x128xf32>
    %43 = arith.addf %40, %42 : vector<1x128xf32>
    %c0_26 = arith.constant 0 : index
    %c0_27 = arith.constant 0 : index
    %44 = vector.load %arg11[%c0_26, %c0_27] : memref<1x128xf32, #tpu.memory_space<vmem>>, vector<1x128xf32>
    tpu.vector_store %arg11[%c0_26, %c0_27], %43 {strides = array<i32>} : memref<1x128xf32, #tpu.memory_space<vmem>>, vector<1x128xf32>,
    %cst_28 = arith.constant 0.000000e+00 : f32
    %45 = vector.broadcast %cst_28 : f32 to vector<16x128xf32>
    %46 = arith.cmpf ogt, %10, %45 : vector<16x128xf32>
    %cst_29 = arith.constant -1.000000e+30 : f32
    %47 = vector.broadcast %cst_29 : f32 to vector<16x128xf32>
    %48 = arith.select %46, %9, %47 : vector<16x128xi1>, vector<16x128xf32>
    %cst_30 = arith.constant dense<0xFF800000> : vector<128xf32>
    %49 = vector.multi_reduction <maximumf>, %48, %cst_30 [0] : vector<16x128xf32> to vector<128xf32>
    %50 = vector.shape_cast %49 : vector<128xf32> to vector<1x128xf32>
    %cst_31 = arith.constant -1.000000e+29 : f32
    %51 = vector.broadcast %cst_31 : f32 to vector<1x128xf32>
    %52 = arith.cmpf ogt, %50, %51 : vector<1x128xf32>
    %cst_32 = arith.constant 0.000000e+00 : f32
    %53 = vector.broadcast %cst_32 : f32 to vector<1x128xf32>
    %54 = arith.select %52, %50, %53 : vector<1x128xi1>, vector<1x128xf32>
    %55 = vector.broadcast %54 : vector<1x128xf32> to vector<16x128xf32>
    %56 = arith.subf %48, %55 : vector<16x128xf32>
    %57 = math.exp %56 : vector<16x128xf32>
    %cst_33 = arith.constant dense<0.000000e+00> : vector<128xf32>
    %58 = vector.multi_reduction <add>, %57, %cst_33 [0] : vector<16x128xf32> to vector<128xf32>
    %59 = vector.shape_cast %58 : vector<128xf32> to vector<1x128xf32>
    %cst_34 = arith.constant 9.99999968E-21 : f32
    %60 = vector.broadcast %cst_34 : f32 to vector<1x128xf32>
    %61 = arith.addf %59, %60 : vector<1x128xf32>
    %62 = tpu.reciprocal %61 {approx = true} : vector<1x128xf32> -> vector<1x128xf32>
    %63 = vector.broadcast %62 : vector<1x128xf32> to vector<16x128xf32>
    %64 = arith.mulf %57, %63 : vector<16x128xf32>
    %c0_35 = arith.constant 0 : index
    %c0_36 = arith.constant 0 : index
    %65 = vector.load %arg9[%c0_35, %c0_36] : memref<16x128xf32, #tpu.memory_space<vmem>>, vector<16x128xf32>
    %66 = arith.truncf %64 : vector<16x128xf32> to vector<16x128xbf16>
    %cst_37 = arith.constant dense<0.000000e+00> : vector<16x128xf32>
    %67 = tpu.matmul %66, %8, %cst_37 {dimension_numbers = #tpu.dot_dimension_numbers<[1], [0], [0], [1], [0, 0, 1, 1], [], []>} : vector<16x128xbf16>, vector<128x128xbf16>, vector<16x128xf32> -> vector<16x128xf32>
    %68 = arith.addf %65, %67 : vector<16x128xf32>
    %c0_38 = arith.constant 0 : index
    %c0_39 = arith.constant 0 : index
    %69 = vector.load %arg9[%c0_38, %c0_39] : memref<16x128xf32, #tpu.memory_space<vmem>>, vector<16x128xf32>
    tpu.vector_store %arg9[%c0_38, %c0_39], %68 {strides = array<i32>} : memref<16x128xf32, #tpu.memory_space<vmem>>, vector<16x128xf32>,
    %c0_40 = arith.constant 0 : index
    %c0_41 = arith.constant 0 : index
    %70 = vector.load %arg12[%c0_40, %c0_41] : memref<1x128xf32, #tpu.memory_space<vmem>>, vector<1x128xf32>
    %71 = arith.extf %8 : vector<128x128xbf16> to vector<128x128xf32>
    %cst_42 = arith.constant dense<0.000000e+00> : vector<128xf32>
    %72 = vector.multi_reduction <add>, %71, %cst_42 [0] : vector<128x128xf32> to vector<128xf32>
    %73 = vector.shape_cast %72 : vector<128xf32> to vector<1x128xf32>
    %74 = arith.addf %70, %73 : vector<1x128xf32>
    %c0_43 = arith.constant 0 : index
    %c0_44 = arith.constant 0 : index
    %75 = vector.load %arg12[%c0_43, %c0_44] : memref<1x128xf32, #tpu.memory_space<vmem>>, vector<1x128xf32>
    tpu.vector_store %arg12[%c0_43, %c0_44], %74 {strides = array<i32>} : memref<1x128xf32, #tpu.memory_space<vmem>>, vector<1x128xf32>,
    %c1_i32 = arith.constant 1 : i32
    %76 = arith.cmpi eq, %arg1, %c1_i32 : i32
    %77 = arith.extui %76 : i1 to i32
    %c0_i32_45 = arith.constant 0 : i32
    %78 = arith.cmpi ne, %77, %c0_i32_45 : i32
    scf.if %78 {
      %c0_46 = arith.constant 0 : index
      %c0_47 = arith.constant 0 : index
      %c0_48 = arith.constant 0 : index
      %79 = vector.load %arg5[%c0_46, %c0_47, %c0_48] : memref<1x16x8xf32, #tpu.memory_space<vmem>>, vector<1x16x8xf32>
      %80 = vector.shape_cast %79 : vector<1x16x8xf32> to vector<16x8xf32>
      %c0_49 = arith.constant 0 : index
      %c0_50 = arith.constant 0 : index
      %c0_51 = arith.constant 0 : index
      %81 = vector.load %arg6[%c0_49, %c0_50, %c0_51] : memref<1x4x128xf32, #tpu.memory_space<vmem>>, vector<1x4x128xf32>
      %82 = vector.shape_cast %81 : vector<1x4x128xf32> to vector<4x128xf32>
      %83 = vector.extract_strided_slice %80 {offsets = [0, 0], sizes = [16, 1], strides = [1, 1]} : vector<16x8xf32> to vector<16x1xf32>
      %84 = vector.extract_strided_slice %80 {offsets = [0, 1], sizes = [16, 1], strides = [1, 1]} : vector<16x8xf32> to vector<16x1xf32>
      %85 = vector.extract_strided_slice %80 {offsets = [0, 2], sizes = [16, 1], strides = [1, 1]} : vector<16x8xf32> to vector<16x1xf32>
      %86 = vector.extract_strided_slice %80 {offsets = [0, 3], sizes = [16, 1], strides = [1, 1]} : vector<16x8xf32> to vector<16x1xf32>
      %87 = vector.extract_strided_slice %80 {offsets = [0, 4], sizes = [16, 1], strides = [1, 1]} : vector<16x8xf32> to vector<16x1xf32>
      %88 = vector.extract_strided_slice %80 {offsets = [0, 5], sizes = [16, 1], strides = [1, 1]} : vector<16x8xf32> to vector<16x1xf32>
      %89 = vector.extract_strided_slice %82 {offsets = [0, 0], sizes = [1, 128], strides = [1, 1]} : vector<4x128xf32> to vector<1x128xf32>
      %90 = vector.extract_strided_slice %82 {offsets = [1, 0], sizes = [1, 128], strides = [1, 1]} : vector<4x128xf32> to vector<1x128xf32>
      %91 = vector.extract_strided_slice %82 {offsets = [2, 0], sizes = [1, 128], strides = [1, 1]} : vector<4x128xf32> to vector<1x128xf32>
      %92 = vector.extract_strided_slice %82 {offsets = [3, 0], sizes = [1, 128], strides = [1, 1]} : vector<4x128xf32> to vector<1x128xf32>
      %cst_52 = arith.constant 0.000000e+00 : f32
      %93 = vector.broadcast %cst_52 : f32 to vector<16x1xf32>
      %94 = arith.subf %93, %83 : vector<16x1xf32>
      %cst_53 = arith.constant 0.000000e+00 : f32
      %95 = vector.broadcast %cst_53 : f32 to vector<16x1xf32>
      %96 = arith.maximumf %94, %95 : vector<16x1xf32>
      %97 = math.absf %83 : vector<16x1xf32>
      %cst_54 = arith.constant 0.000000e+00 : f32
      %98 = vector.broadcast %cst_54 : f32 to vector<16x1xf32>
      %99 = arith.subf %98, %97 : vector<16x1xf32>
      %100 = math.exp %99 : vector<16x1xf32>
      %cst_55 = arith.constant 1.000000e+00 : f32
      %101 = vector.broadcast %cst_55 : f32 to vector<16x1xf32>
      %102 = arith.addf %101, %100 : vector<16x1xf32>
      %103 = math.log %102 : vector<16x1xf32>
      %104 = arith.addf %96, %103 : vector<16x1xf32>
      %105 = tpu.iota {dimensions = array<i32: 1>} : vector<1x128xi32>
      %c8_i32 = arith.constant 8 : i32
      %106 = vector.broadcast %c8_i32 : i32 to vector<1x128xi32>
      %107 = arith.cmpi slt, %105, %106 : vector<1x128xi32>
      %c0_56 = arith.constant 0 : index
      %c0_57 = arith.constant 0 : index
      %108 = vector.load %arg11[%c0_56, %c0_57] : memref<1x128xf32, #tpu.memory_space<vmem>>, vector<1x128xf32>
      %cst_58 = arith.constant 0.000000e+00 : f32
      %109 = vector.broadcast %cst_58 : f32 to vector<1x128xf32>
      %110 = arith.select %107, %108, %109 : vector<1x128xi1>, vector<1x128xf32>
      %cst_59 = arith.constant dense<0.000000e+00> : vector<1xf32>
      %111 = vector.multi_reduction <add>, %110, %cst_59 [1] : vector<1x128xf32> to vector<1xf32>
      %112 = vector.shape_cast %111 : vector<1xf32> to vector<1x1xf32>
      %cst_60 = arith.constant 1.000000e+00 : f32
      %113 = vector.broadcast %cst_60 : f32 to vector<1x1xf32>
      %114 = arith.maximumf %112, %113 : vector<1x1xf32>
      %c0_61 = arith.constant 0 : index
      %c0_62 = arith.constant 0 : index
      %115 = vector.load %arg8[%c0_61, %c0_62] : memref<16x128xf32, #tpu.memory_space<vmem>>, vector<16x128xf32>
      %c0_63 = arith.constant 0 : index
      %c0_64 = arith.constant 0 : index
      %116 = vector.load %arg10[%c0_63, %c0_64] : memref<16x1xf32, #tpu.memory_space<vmem>>, vector<16x1xf32>
      %117 = vector.broadcast %116 : vector<16x1xf32> to vector<16x128xf32>
      %118 = arith.addf %115, %117 : vector<16x128xf32>
      %119 = vector.broadcast %114 : vector<1x1xf32> to vector<16x128xf32>
      %120 = arith.divf %118, %119 : vector<16x128xf32>
      %c0_65 = arith.constant 0 : index
      %c0_66 = arith.constant 0 : index
      %121 = vector.load %arg9[%c0_65, %c0_66] : memref<16x128xf32, #tpu.memory_space<vmem>>, vector<16x128xf32>
      %122 = tpu.iota {dimensions = array<i32: 1>} : vector<16x128xi32>
      %c8_i32_67 = arith.constant 8 : i32
      %123 = vector.broadcast %c8_i32_67 : i32 to vector<16x128xi32>
      %124 = arith.cmpi eq, %122, %123 : vector<16x128xi32>
      %cst_68 = arith.constant 0.000000e+00 : f32
      %125 = vector.broadcast %cst_68 : f32 to vector<16x128xf32>
      %126 = arith.select %124, %121, %125 : vector<16x128xi1>, vector<16x128xf32>
      %cst_69 = arith.constant dense<0.000000e+00> : vector<16xf32>
      %127 = vector.multi_reduction <add>, %126, %cst_69 [1] : vector<16x128xf32> to vector<16xf32>
      %128 = vector.shape_cast %127 : vector<16xf32> to vector<16x1xf32>
      %c0_70 = arith.constant 0 : index
      %c0_71 = arith.constant 0 : index
      %129 = vector.load %arg12[%c0_70, %c0_71] : memref<1x128xf32, #tpu.memory_space<vmem>>, vector<1x128xf32>
      %130 = vector.broadcast %128 : vector<16x1xf32> to vector<16x128xf32>
      %131 = vector.broadcast %129 : vector<1x128xf32> to vector<16x128xf32>
      %132 = arith.addf %130, %131 : vector<16x128xf32>
      %cst_72 = arith.constant 1.000000e+00 : f32
      %133 = vector.broadcast %cst_72 : f32 to vector<16x128xf32>
      %134 = arith.addf %132, %133 : vector<16x128xf32>
      %cst_73 = arith.constant 2.000000e+00 : f32
      %135 = vector.broadcast %cst_73 : f32 to vector<16x128xf32>
      %136 = arith.mulf %135, %121 : vector<16x128xf32>
      %cst_74 = arith.constant 1.000000e+00 : f32
      %137 = vector.broadcast %cst_74 : f32 to vector<16x128xf32>
      %138 = arith.addf %136, %137 : vector<16x128xf32>
      %139 = arith.divf %138, %134 : vector<16x128xf32>
      %cst_75 = arith.constant 1.000000e+00 : f32
      %140 = vector.broadcast %cst_75 : f32 to vector<16x128xf32>
      %141 = arith.subf %140, %139 : vector<16x128xf32>
      %142 = vector.broadcast %84 : vector<16x1xf32> to vector<16x128xf32>
      %143 = vector.broadcast %89 : vector<1x128xf32> to vector<16x128xf32>
      %144 = arith.subf %142, %143 : vector<16x128xf32>
      %145 = vector.broadcast %85 : vector<16x1xf32> to vector<16x128xf32>
      %146 = vector.broadcast %90 : vector<1x128xf32> to vector<16x128xf32>
      %147 = arith.subf %145, %146 : vector<16x128xf32>
      %148 = math.absf %144 : vector<16x128xf32>
      %cst_76 = arith.constant 1.000000e+00 : f32
      %149 = vector.broadcast %cst_76 : f32 to vector<16x128xf32>
      %150 = arith.cmpf olt, %148, %149 : vector<16x128xf32>
      %cst_77 = arith.constant 5.000000e-01 : f32
      %151 = vector.broadcast %cst_77 : f32 to vector<16x128xf32>
      %152 = arith.mulf %151, %144 : vector<16x128xf32>
      %153 = arith.mulf %152, %144 : vector<16x128xf32>
      %cst_78 = arith.constant 5.000000e-01 : f32
      %154 = vector.broadcast %cst_78 : f32 to vector<16x128xf32>
      %155 = arith.subf %148, %154 : vector<16x128xf32>
      %156 = arith.select %150, %153, %155 : vector<16x128xi1>, vector<16x128xf32>
      %157 = math.absf %147 : vector<16x128xf32>
      %cst_79 = arith.constant 1.000000e+00 : f32
      %158 = vector.broadcast %cst_79 : f32 to vector<16x128xf32>
      %159 = arith.cmpf olt, %157, %158 : vector<16x128xf32>
      %cst_80 = arith.constant 5.000000e-01 : f32
      %160 = vector.broadcast %cst_80 : f32 to vector<16x128xf32>
      %161 = arith.mulf %160, %147 : vector<16x128xf32>
      %162 = arith.mulf %161, %147 : vector<16x128xf32>
      %cst_81 = arith.constant 5.000000e-01 : f32
      %163 = vector.broadcast %cst_81 : f32 to vector<16x128xf32>
      %164 = arith.subf %157, %163 : vector<16x128xf32>
      %165 = arith.select %159, %162, %164 : vector<16x128xi1>, vector<16x128xf32>
      %166 = arith.addf %156, %165 : vector<16x128xf32>
      %cst_82 = arith.constant 5.000000e-01 : f32
      %167 = vector.broadcast %cst_82 : f32 to vector<16x128xf32>
      %168 = arith.mulf %167, %166 : vector<16x128xf32>
      %169 = vector.broadcast %89 : vector<1x128xf32> to vector<16x128xf32>
      %170 = vector.broadcast %84 : vector<16x1xf32> to vector<16x128xf32>
      %171 = arith.subf %169, %170 : vector<16x128xf32>
      %172 = vector.broadcast %91 : vector<1x128xf32> to vector<16x128xf32>
      %173 = arith.mulf %171, %172 : vector<16x128xf32>
      %174 = vector.broadcast %90 : vector<1x128xf32> to vector<16x128xf32>
      %175 = vector.broadcast %85 : vector<16x1xf32> to vector<16x128xf32>
      %176 = arith.subf %174, %175 : vector<16x128xf32>
      %177 = vector.broadcast %92 : vector<1x128xf32> to vector<16x128xf32>
      %178 = arith.mulf %176, %177 : vector<16x128xf32>
      %179 = vector.broadcast %86 : vector<16x1xf32> to vector<16x128xf32>
      %180 = arith.divf %173, %179 : vector<16x128xf32>
      %181 = vector.broadcast %87 : vector<16x1xf32> to vector<16x128xf32>
      %182 = arith.mulf %181, %180 : vector<16x128xf32>
      %183 = arith.subf %178, %182 : vector<16x128xf32>
      %184 = vector.broadcast %88 : vector<16x1xf32> to vector<16x128xf32>
      %185 = arith.divf %183, %184 : vector<16x128xf32>
      %186 = arith.mulf %180, %180 : vector<16x128xf32>
      %187 = arith.mulf %185, %185 : vector<16x128xf32>
      %188 = arith.addf %186, %187 : vector<16x128xf32>
      %cst_83 = arith.constant -5.000000e-01 : f32
      %189 = vector.broadcast %cst_83 : f32 to vector<16x128xf32>
      %190 = arith.mulf %189, %188 : vector<16x128xf32>
      %191 = arith.mulf %86, %88 : vector<16x1xf32>
      %192 = math.log %191 : vector<16x1xf32>
      %193 = vector.broadcast %192 : vector<16x1xf32> to vector<16x128xf32>
      %194 = arith.subf %190, %193 : vector<16x128xf32>
      %cst_84 = arith.constant 1.83787704 : f32
      %195 = vector.broadcast %cst_84 : f32 to vector<16x128xf32>
      %196 = arith.subf %194, %195 : vector<16x128xf32>
      %cst_85 = arith.constant 0.000000e+00 : f32
      %197 = vector.broadcast %cst_85 : f32 to vector<16x128xf32>
      %198 = arith.subf %197, %196 : vector<16x128xf32>
      %199 = math.exp %196 : vector<16x128xf32>
      %cst_86 = arith.constant 1.000000e+00 : f32
      %200 = vector.broadcast %cst_86 : f32 to vector<16x128xf32>
      %201 = arith.subf %200, %199 : vector<16x128xf32>
      %cst_87 = arith.constant 1.000000e+00 : f32
      %202 = vector.broadcast %cst_87 : f32 to vector<16x1xf32>
      %203 = arith.mulf %202, %104 : vector<16x1xf32>
      %cst_88 = arith.constant 1.000000e+00 : f32
      %204 = vector.broadcast %cst_88 : f32 to vector<16x128xf32>
      %205 = arith.mulf %204, %120 : vector<16x128xf32>
      %206 = vector.broadcast %203 : vector<16x1xf32> to vector<16x128xf32>
      %207 = arith.addf %206, %205 : vector<16x128xf32>
      %cst_89 = arith.constant 1.000000e+00 : f32
      %208 = vector.broadcast %cst_89 : f32 to vector<16x128xf32>
      %209 = arith.mulf %208, %141 : vector<16x128xf32>
      %210 = arith.addf %207, %209 : vector<16x128xf32>
      %cst_90 = arith.constant 1.000000e+00 : f32
      %211 = vector.broadcast %cst_90 : f32 to vector<16x128xf32>
      %212 = arith.mulf %211, %168 : vector<16x128xf32>
      %213 = arith.addf %210, %212 : vector<16x128xf32>
      %cst_91 = arith.constant 5.000000e-01 : f32
      %214 = vector.broadcast %cst_91 : f32 to vector<16x128xf32>
      %215 = arith.mulf %214, %198 : vector<16x128xf32>
      %216 = arith.addf %213, %215 : vector<16x128xf32>
      %cst_92 = arith.constant 5.000000e-01 : f32
      %217 = vector.broadcast %cst_92 : f32 to vector<16x128xf32>
      %218 = arith.mulf %217, %201 : vector<16x128xf32>
      %219 = arith.addf %216, %218 : vector<16x128xf32>
      %c0_93 = arith.constant 0 : index
      %c0_94 = arith.constant 0 : index
      %c0_95 = arith.constant 0 : index
      %220 = vector.load %arg7[%c0_93, %c0_94, %c0_95] : memref<1x16x128xf32, #tpu.memory_space<vmem>>, vector<1x16x128xf32>
      %221 = vector.shape_cast %220 : vector<1x16x128xf32> to vector<16x128xf32>
      %222 = vector.shape_cast %219 : vector<16x128xf32> to vector<1x16x128xf32>
      tpu.vector_store %arg7[%c0_93, %c0_94, %c0_95], %222 {strides = array<i32>} : memref<1x16x128xf32, #tpu.memory_space<vmem>>, vector<1x16x128xf32>,
    } else {
    }
    return
  }
  func.func @transform_0(%arg0: i32, %arg1: i32) -> (i32, i32, i32) {
    %c0_i32 = arith.constant 0 : i32
    %c0_i32_0 = arith.constant 0 : i32
    return %arg0, %c0_i32, %arg1 : i32, i32, i32
  }
  func.func @transform_1(%arg0: i32, %arg1: i32) -> (i32, i32, i32) {
    %c0_i32 = arith.constant 0 : i32
    %c0_i32_0 = arith.constant 0 : i32
    return %arg0, %c0_i32, %arg1 : i32, i32, i32
  }
  func.func @transform_2(%arg0: i32, %arg1: i32) -> (i32, i32, i32) {
    %c0_i32 = arith.constant 0 : i32
    %c0_i32_0 = arith.constant 0 : i32
    return %arg0, %arg1, %c0_i32 : i32, i32, i32
  }
  func.func @transform_3(%arg0: i32, %arg1: i32) -> (i32, i32, i32) {
    %c0_i32 = arith.constant 0 : i32
    %c0_i32_0 = arith.constant 0 : i32
    %c0_i32_1 = arith.constant 0 : i32
    return %arg0, %c0_i32, %c0_i32_0 : i32, i32, i32
  }
  func.func @transform_4(%arg0: i32, %arg1: i32) -> (i32, i32, i32) {
    %c0_i32 = arith.constant 0 : i32
    %c0_i32_0 = arith.constant 0 : i32
    %c0_i32_1 = arith.constant 0 : i32
    return %arg0, %c0_i32, %c0_i32_0 : i32, i32, i32
  }
  func.func @transform_5(%arg0: i32, %arg1: i32) -> (i32, i32, i32) {
    %c0_i32 = arith.constant 0 : i32
    %c0_i32_0 = arith.constant 0 : i32
    %c0_i32_1 = arith.constant 0 : i32
    return %arg0, %c0_i32, %c0_i32_0 : i32, i32, i32
  }
}

</mosaic_0001>

<bundles_post_ra>
// kernel: hungarian_matcher_costs.1
= control target key start
LH: loop header
LB: loop body
LE: loop exit
PB: predicated region body
PF: predicated region fallthrough
CT: control target
= control target key end

     0   :  { %s1972_s0 = inlined_call_operand.vmem [shape: bf16[2,16,256], index: 0, kind: input, shape index: {}]   ;;  %s1973_s1 = inlined_call_operand.vmem [shape: bf16[2,16,256], index: 1, kind: input, shape index: {}]   ;;  %s1974_s2 = inlined_call_operand.vmem [shape: bf16[2,256,128], index: 2, kind: input, shape index: {}]   ;;  %s1975_s3 = inlined_call_operand.vmem [shape: f32[2,16,8], index: 3, kind: input, shape index: {}]   ;;  %s1976_s4 = inlined_call_operand.vmem [shape: f32[2,4,128], index: 4, kind: input, shape index: {}]   ;;  %s1977_s5 = inlined_call_operand.vmem [shape: f32[2,16,128], index: 5, kind: output, shape index: {}]  }
   0x1   :  { %1979 = sst [smem:[#allocation10_spill]] %s1972_s0 }
   0x2   :  { %1980 = sst [smem:[#allocation11_spill]] %s1973_s1 }
   0x3   :  { %s1619_s18 = smov 0   ;;  %s1621_s19 = smov 0  }
   0x4   :  { %s1623_s20 = smov 0   ;;  %s1625_s21 = smov 0  }
   0x5   :  { %s1627_s22 = smov 0   ;;  %s1629_s23 = smov 0  }
   0x6   :  { %s1631_s24 = smov 0  }
   0x7 LB: > { %s24_s25 = sadd.s32 1, %s1567_s22  ;;  %s27_s26 = sadd.s32 1, %s1571_s23  ;;  %s1575_s24 = sphi %s1631_s24, %s15_s24   ;;  %s1571_s23 = sphi %s1629_s23, %s2013_s23   ;;  %s1567_s22 = sphi %s1627_s22, %s2012_s22   ;;  %s1563_s21 = sphi %s1625_s21, %s2011_s21   ;;  %s1559_s20 = sphi %s1623_s20, %s2010_s20   ;;  %s1555_s19 = sphi %s1621_s19, %s2009_s19   ;;  %s1551_s18 = sphi %s1619_s18, %s2008_s18  }
   0x8   : > { %p25_p0 = scmp.ge.s32.totalorder %s24_s25, 2  ;;  %p43_p1 = scmp.ne.s32.totalorder %s1555_s19, %s1551_s18 }
   0x9   : > { %p44_p2 = scmp.eq.s32.totalorder %s1575_s24, 0  ;;  %s36_s6 = sadd.s32 1, %s1555_s19 }
   0xa   : > { %s2015_s25 = smov (%p25_p0, %s24_s25), 0  ;;  %s2017_s26 = smov (!%p25_p0, %s27_s26), %s1571_s23 }
   0xb   : > { %p1662_p3 = por %p44_p2, %p43_p1  ;;  %p29_p4 = scmp.ge.s32.totalorder %s2017_s26, 2 }
   0xc   : > { %s32_s28 = ssub.s32 %s1567_s22, %s2015_s25  ;;  %p1252_p6 = scmp.ge.s32.totalorder %s1575_s24, 4 }
   0xd   : > { %s2019_s26 = smov (%p29_p4, %s2017_s26), 0 }
   0xe   : > { %1982 = sst [smem:[#allocation9_spill]] %s2019_s26  ;;  %s31_s29 = ssub.s32 %s1571_s23, %s2019_s26 }
   0xf   : > { %s33_s30 = sor.u32 %s32_s28, %s31_s29  ;;  %203 = sbr.rel (%p1252_p6) target bundleno = 44 (0x2c), region = 16 }
  0x10   : > { %p34_p5 = scmp.eq.s32.totalorder %s33_s30, 0 }
  0x12   : > { %s1674_s7 = scalar_select %p34_p5, %s1555_s19, %s36_s6  }
  0x16   : > { %206 = sbr.rel (!%p1662_p3) target bundleno = 33 (0x21), region = 20  ;;  %s208_s8 = sand.u32 (%p1662_p3), 1, %s1555_s19  }
  0x17   : > { %s1254_s9 = sshll.u32 (%p1662_p3), %s1571_s23, 2  ;;  %s1253_s10 = sshll.u32 (%p1662_p3), %s208_s8, 3 }
  0x18   : > { %s212_s11 = sadd.s32 (%p1662_p3), %s1567_s22, %s1254_s9  ;;  %s1983_s0 = sld [smem:[#allocation10_spill]] (%p1662_p3) }
  0x19   : > { %s1255_s12 = sshll.u32 (%p1662_p3), %s212_s11, 2  ;;  %s210_s16 = scalar_lea.vmem (%p1662_p3), [#allocation7], %s1253_s10 }
  0x1e   : > { %s214_s15 = scalar_lea.vmem %s1983_s0, %s1255_s12 }
  0x1f   : > { %v230_v0 = vld [vmem:[%s214_s15] sm:$0xf]  ;;  %v232_v1 = vld [vmem:[%s214_s15 + $0x8] sm:$0xf] }
  0x20   : > { %231 = vst [vmem:[%s210_s16] sm:$0xf] %v230_v0  ;;  %233 = vst [vmem:[%s210_s16 + $0x4] sm:$0xf] %v232_v1 }
  0x21 PF: > { %260 = sbr.rel (!%p1662_p3) target bundleno = 44 (0x2c), region = 61  ;;  %s262_s17 = sand.u32 (%p1662_p3), 1, %s1555_s19  }
  0x22   : > { %s1257_s28 = sshll.u32 (%p1662_p3), %s1571_s23, 2  ;;  %s1256_s29 = sshll.u32 (%p1662_p3), %s262_s17, 3 }
  0x23   : > { %s266_s30 = sadd.s32 (%p1662_p3), %s1567_s22, %s1257_s28  ;;  %s1984_s1 = sld [smem:[#allocation11_spill]] (%p1662_p3) }
  0x24   : > { %s1258_s6 = sshll.u32 (%p1662_p3), %s266_s30, 2  ;;  %s264_s10 = scalar_lea.vmem (%p1662_p3), [#allocation8], %s1256_s29 }
  0x29   : > { %s268_s11 = scalar_lea.vmem %s1984_s1, %s1258_s6 }
  0x2a   : > { %v284_v2 = vld [vmem:[%s268_s11] sm:$0xf]  ;;  %v286_v3 = vld [vmem:[%s268_s11 + $0x8] sm:$0xf] }
  0x2b   : > { %285 = vst [vmem:[%s264_s10] sm:$0xf] %v284_v2  ;;  %287 = vst [vmem:[%s264_s10 + $0x4] sm:$0xf] %v286_v3 }
  0x2c PF: > { %p1259_p7 = scmp.ge.s32.totalorder %s1575_s24, 1  ;;  %p341_p8 = scmp.lt.s32.totalorder %s1575_s24, 5 }
  0x2e   : > { %p342_p9 = pnand %p1259_p7, %p341_p8 }
  0x2f   : > { %s348_s27 = sand.u32 (!%p342_p9), 1, %s1551_s18   ;;  %s1262_s12 = sshll.u32 (!%p342_p9), %s1559_s20, 4 }
  0x30   : > { %345 = sbr.rel (%p342_p9) target bundleno = 566 (0x236), region = 114  ;;  %s1697_s13 = sshll.u32 (!%p342_p9), %s348_s27, 3 }
  0x31   : > { %p405_p10 = scmp.lt.s32.totalorder (!%p342_p9), %s1563_s21, 1  ;;  %p407_p11 = scmp.lt.s32.totalorder (!%p342_p9), %s1262_s12, 31 }
  0x32   : > { %s350_s16 = scalar_lea.vmem (!%p342_p9), [#allocation7], %s1697_s13  ;;  %s357_s17 = scalar_lea.vmem (!%p342_p9), [#allocation8], %s1697_s13 }
  0x33   : > { %p1270_p12 = scmp.ne.s32.totalorder (!%p342_p9), %s1559_s20, 0 }
  0x37   : > { %s2021_s21 = smov (!%p405_p10, %s1563_s21), 1  ;;  %s2023_s12 = smov (!%p407_p11, %s1262_s12), 31 }
  0x38   : > { %s1263_s14 = sshll.u32 %s2021_s21, 5  ;;  %s1321_s15 = sshll.u32 %s2021_s21, 4  ;;  %vm439_vm0 = vcmask (!%p1270_p12), 7168   ;;  %v1577_v4 = vmov (!%p1270_p12), 0.0  }
  0x39   : > { %s1704_s28 = scalar_lea.vmem %s1975_s3, %s1321_s15  ;;  %s1267_s29 = sshll.u32 %s2021_s21, 2  ;;  %435 = vst [vmem:[#allocation2] sm:$0xff] (!%p1270_p12), %v1577_v4  ;;  %436 = vst [vmem:[#allocation2 + $0x8] sm:$0xff] (!%p1270_p12), %v1577_v4 }
  0x3a   : > { %s410_s30 = sadd.s32 %s1263_s14, %s2023_s12  ;;  %s1709_s8 = scalar_lea.vmem %s1976_s4, %s1267_s29  ;;  %437 = vst [vmem:[#allocation3] sm:$0xff] (!%p1270_p12), %v1577_v4  ;;  %438 = vst [vmem:[#allocation3 + $0x8] sm:$0xff] (!%p1270_p12), %v1577_v4 }
  0x3b   : > { %s1264_s9 = sshll.u32 %s410_s30, 2  ;;  %s1714_s27 = scalar_lea.vmem %s1977_s5, %s1321_s15  ;;  %442 = vst [vmem:[#allocation5] sm:$0x1] (!%p1270_p12), %v1577_v4  ;;  %443 = vst [vmem:[#allocation6] sm:$0x1] (!%p1270_p12), %v1577_v4 }
  0x3c   : > { %s1719_s26 = scalar_lea.vmem %s1974_s2, %s1264_s9  ;;  %434 = sbr.rel (%p1270_p12) target bundleno = 67 (0x43), region = 126  ;;  %440 = vst.msk [vmem:[#allocation4] sm:$0xff] (!%p1270_p12), %vm439_vm0, %v1577_v4  ;;  %441 = vst.msk [vmem:[#allocation4 + $0x8] sm:$0xff] (!%p1270_p12), %vm439_vm0, %v1577_v4 }
  0x43 PF: > { %v448_v5 = vld [vmem:[%s1719_s26] sm:$0xf]  ;;  %v449_v6 = vld [vmem:[%s1719_s26 + $0x4] sm:$0xf]  ;;  %v1578_v7 = vmov 0.0   ;;  %v1579_v10 = vmov 0  }
  0x44   : > { %1349 = vmatprep.subr.bf16.mxu0 %v1578_v7  ;;  %vm488_vm1 = vcmp.ne.bf16.partialorder %v448_v5, 0  ;;  %vm489_vm2 = vcmp.ne.bf16.partialorder %v449_v6, 0  ;;  %v806_v8 = vunpack.c.l.bf16 %v448_v5  ;;  %1369 = vmatprep.subr.bf16.mxu1 %v1578_v7  ;;  %v450_v9 = vld [vmem:[%s1719_s26 + $0x8] sm:$0xf]  ;;  %v807_v13 = vunpack.c.l.bf16 %v449_v6  ;;  %v451_v15 = vld [vmem:[%s1719_s26 + $0xc] sm:$0xf] }
  0x45   : > { %v504_v11 = vsel %vm488_vm1, 65537, %v1579_v10  ;;  %v505_v12 = vsel %vm489_vm2, 65537, %v1579_v10  ;;  %v1303_v14 = vcombine.low %v448_v5, %v449_v6  ;;  %vm490_vm3 = vcmp.ne.bf16.partialorder %v450_v9, 0  ;;  %v452_v24 = vld [vmem:[%s1719_s26 + $0x10] sm:$0xf]  ;;  %p1311_p13 = scmp.ne.s32.totalorder %s1559_s20, 1 }
  0x46   : > { %v520_v16 = vunpack.c.l.b16 %v504_v11  ;;  %v521_v17 = vunpack.c.l.b16 %v505_v12  ;;  %vm491_vm4 = vcmp.ne.bf16.partialorder %v451_v15, 0  ;;  %v822_v18 = vadd.f32 %v807_v13, %v806_v8  ;;  %v453_v29 = vld [vmem:[%s1719_s26 + $0x14] sm:$0xf]  ;;  %v454_v38 = vld [vmem:[%s1719_s26 + $0x18] sm:$0xf]  ;;  %s1582_s0 = smov (!%p1311_p13), 126  }
  0x47   : > { %1370 = vmatpush3.bf16.msra.mxu1 %v1303_v14  ;;  %v506_v19 = vsel %vm490_vm3, 65537, %v1579_v10  ;;  %v507_v20 = vsel %vm491_vm4, 65537, %v1579_v10  ;;  %v808_v21 = vunpack.c.l.bf16 %v450_v9  ;;  %v809_v27 = vunpack.c.l.bf16 %v451_v15  ;;  %v455_v42 = vld [vmem:[%s1719_s26 + $0x1c] sm:$0xf]  ;;  %v456_v53 = vld [vmem:[%s1719_s26 + $0x20] sm:$0xf] }
  0x48   : > { %vm536_vm5 = vcmp.ne.s32.totalorder %v520_v16, 0  ;;  %vm537_vm6 = vcmp.ne.s32.totalorder %v521_v17, 0  ;;  %v522_v22 = vunpack.c.l.b16 %v506_v19  ;;  %v523_v23 = vunpack.c.l.b16 %v507_v20  ;;  %1371 = vmatprep.subr.bf16.mxu1 %v1578_v7  ;;  %v457_v57 = vld [vmem:[%s1719_s26 + $0x24] sm:$0xf]  ;;  %v458_v4 = vld [vmem:[%s1719_s26 + $0x28] sm:$0xf] }
  0x49   : > { %v1271_v25 = vsel %vm536_vm5, 1.0, %v1578_v7  ;;  %v1272_v26 = vsel %vm537_vm6, 1.0, %v1578_v7  ;;  %vm1287_vm7 = vmpackc.low %vm537_vm6, %vm536_vm5  ;;  %v823_v28 = vadd.f32 %v822_v18, %v808_v21  ;;  %v1580_v30 = vmov 1.0|1.0   ;;  %v459_v11 = vld [vmem:[%s1719_s26 + $0x2c] sm:$0xf] }
  0x4a   : > { %1350 = vmatpush3.bf16.msk.msra.mxu0 %vm1287_vm7, %v1580_v30  ;;  %v656_v31 = vadd.f32 %v1272_v26, %v1271_v25  ;;  %vm1740_vm8 = vcmp.ne.s32.totalorder %v522_v22, 0  ;;  %vm1744_vm9 = vcmp.ne.s32.totalorder %v523_v23, 0  ;;  %v1304_v34 = vcombine.low %v450_v9, %v451_v15  ;;  %v460_v22 = vld [vmem:[%s1719_s26 + $0x30] sm:$0xf]  ;;  %v461_v26 = vld [vmem:[%s1719_s26 + $0x34] sm:$0xf] }
  0x4b   : > { %1351 = vmatprep.subr.bf16.mxu0 %v1578_v7  ;;  %v1273_v35 = vsel %vm1740_vm8, 1.0, %v1578_v7  ;;  %v1274_v36 = vsel %vm1744_vm9, 1.0, %v1578_v7  ;;  %vm1289_vm10 = vmpackc.low %vm1744_vm9, %vm1740_vm8  ;;  %v824_v37 = vadd.f32 %v823_v28, %v809_v27  ;;  %vm492_vm11 = vcmp.ne.bf16.partialorder %v452_v24, 0 }
  0x4c   : > { %v657_v39 = vadd.f32 %v1273_v35, %v656_v31  ;;  %1372 = vmatpush3.bf16.msra.mxu1 %v1304_v34  ;;  %vm493_vm12 = vcmp.ne.bf16.partialorder %v453_v29, 0  ;;  %v508_v40 = vsel %vm492_vm11, 65537, %v1579_v10  ;;  %v810_v41 = vunpack.c.l.bf16 %v452_v24 }
  0x4d   : > { %v509_v43 = vsel %vm493_vm12, 65537, %v1579_v10  ;;  %v524_v44 = vunpack.c.l.b16 %v508_v40  ;;  %v811_v45 = vunpack.c.l.bf16 %v453_v29  ;;  %1373 = vmatprep.subr.bf16.mxu1 %v1578_v7  ;;  %v1305_v46 = vcombine.low %v452_v24, %v453_v29 }
  0x4e   : > { %1352 = vmatpush3.bf16.msk.msra.mxu0 %vm1289_vm10, %v1580_v30  ;;  %v658_v47 = vadd.f32 %v1274_v36, %v657_v39  ;;  %v525_v48 = vunpack.c.l.b16 %v509_v43  ;;  %v825_v49 = vadd.f32 %v824_v37, %v810_v41  ;;  %vm494_vm13 = vcmp.ne.bf16.partialorder %v454_v38, 0  ;;  %v1834_v41 = vld [vmem:[%s1719_s26 + $0x38] sm:$0xf] }
  0x4f   : > { %1353 = vmatprep.subr.bf16.mxu0 %v1578_v7  ;;  %vm1766_vm14 = vcmp.ne.s32.totalorder %v524_v44, 0  ;;  %vm495_vm15 = vcmp.ne.bf16.partialorder %v455_v42, 0  ;;  %v510_v51 = vsel %vm494_vm13, 65537, %v1579_v10  ;;  %v812_v52 = vunpack.c.l.bf16 %v454_v38 }
  0x50   : > { %vm541_vm0 = vcmp.ne.s32.totalorder %v525_v48, 0  ;;  %v1275_v54 = vsel %vm1766_vm14, 1.0, %v1578_v7  ;;  %v826_v55 = vadd.f32 %v825_v49, %v811_v45  ;;  %1374 = vmatpush3.bf16.msra.mxu1 %v1305_v46  ;;  %v511_v56 = vsel %vm495_vm15, 65537, %v1579_v10  ;;  %v463_v46 = vld [vmem:[%s1719_s26 + $0x3c] sm:$0xf] }
  0x51   : > { %v1276_v58 = vsel %vm541_vm0, 1.0, %v1578_v7  ;;  %vm1291_vm1 = vmpackc.low %vm541_vm0, %vm1766_vm14  ;;  %v659_v59 = vadd.f32 %v1275_v54, %v658_v47  ;;  %v526_v60 = vunpack.c.l.b16 %v510_v51  ;;  %v527_v61 = vunpack.c.l.b16 %v511_v56  ;;  %1375 = vmatprep.subr.bf16.mxu1 %v1578_v7 }
  0x52   : > { %1354 = vmatpush3.bf16.msk.msra.mxu0 %vm1291_vm1, %v1580_v30  ;;  %v813_v62 = vunpack.c.l.bf16 %v455_v42  ;;  %v827_v63 = vadd.f32 %v826_v55, %v812_v52  ;;  %v1306_v0 = vcombine.low %v454_v38, %v455_v42  ;;  %vm496_vm2 = vcmp.ne.bf16.partialorder %v456_v53, 0  ;;  %v1324_v55 = vld [vmem:[%s350_s16] sm:$0xff]  }
  0x53   : > { %v660_v1 = vadd.f32 %v1276_v58, %v659_v59  ;;  %1355 = vmatprep.subr.bf16.mxu0 %v1578_v7  ;;  %vm1783_vm3 = vcmp.ne.s32.totalorder %v526_v60, 0  ;;  %vm1787_vm4 = vcmp.ne.s32.totalorder %v527_v61, 0  ;;  %vm497_vm5 = vcmp.ne.bf16.partialorder %v457_v57, 0 }
  0x54   : > { %v1277_v5 = vsel %vm1783_vm3, 1.0, %v1578_v7  ;;  %v1278_v6 = vsel %vm1787_vm4, 1.0, %v1578_v7  ;;  %vm1293_vm6 = vmpackc.low %vm1787_vm4, %vm1783_vm3  ;;  %v828_v8 = vadd.f32 %v827_v63, %v813_v62  ;;  %1376 = vmatpush3.bf16.msra.mxu1 %v1306_v0  ;;  %v512_v9 = vsel %vm496_vm2, 65537, %v1579_v10  ;;  %v1328_v0 = vld [vmem:[%s357_s17] sm:$0xff]  }
  0x55   : > { %v661_v12 = vadd.f32 %v1277_v5, %v660_v1  ;;  %v513_v13 = vsel %vm497_vm5, 65537, %v1579_v10  ;;  %v528_v14 = vunpack.c.l.b16 %v512_v9  ;;  %v814_v15 = vunpack.c.l.bf16 %v456_v53  ;;  %1377 = vmatprep.subr.bf16.mxu1 %v1578_v7 }
  0x56   : > { %1356 = vmatpush3.bf16.msk.msra.mxu0 %vm1293_vm6, %v1580_v30  ;;  %v529_v16 = vunpack.c.l.b16 %v513_v13  ;;  %v815_v17 = vunpack.c.l.bf16 %v457_v57  ;;  %v1307_v18 = vcombine.low %v456_v53, %v457_v57  ;;  %vm498_vm7 = vcmp.ne.bf16.partialorder %v458_v4, 0 }
  0x57   : > { %v662_v19 = vadd.f32 %v1278_v6, %v661_v12  ;;  %1357 = vmatprep.subr.bf16.mxu0 %v1578_v7  ;;  %vm1808_vm8 = vcmp.ne.s32.totalorder %v528_v14, 0  ;;  %v829_v21 = vadd.f32 %v828_v8, %v814_v15  ;;  %vm499_vm9 = vcmp.ne.bf16.partialorder %v459_v11, 0 }
  0x58   : > { %vm545_vm10 = vcmp.ne.s32.totalorder %v529_v16, 0  ;;  %v1279_v23 = vsel %vm1808_vm8, 1.0, %v1578_v7  ;;  %1378 = vmatpush3.bf16.msra.mxu1 %v1307_v18  ;;  %v514_v24 = vsel %vm498_vm7, 65537, %v1579_v10  ;;  %v515_v25 = vsel %vm499_vm9, 65537, %v1579_v10 }
  0x59   : > { %v1280_v27 = vsel %vm545_vm10, 1.0, %v1578_v7  ;;  %vm1295_vm11 = vmpackc.low %vm545_vm10, %vm1808_vm8  ;;  %v663_v28 = vadd.f32 %v1279_v23, %v662_v19  ;;  %v830_v29 = vadd.f32 %v829_v21, %v815_v17  ;;  %v530_v31 = vunpack.c.l.b16 %v514_v24  ;;  %1379 = vmatprep.subr.bf16.mxu1 %v1578_v7 }
  0x5a   : > { %1358 = vmatpush3.bf16.msk.msra.mxu0 %vm1295_vm11, %v1580_v30  ;;  %v531_v32 = vunpack.c.l.b16 %v515_v25  ;;  %v816_v33 = vunpack.c.l.bf16 %v458_v4  ;;  %v817_v34 = vunpack.c.l.bf16 %v459_v11  ;;  %v1308_v35 = vcombine.low %v458_v4, %v459_v11 }
  0x5b   : > { %v664_v36 = vadd.f32 %v1280_v27, %v663_v28  ;;  %1359 = vmatprep.subr.bf16.mxu0 %v1578_v7  ;;  %vm1825_vm12 = vcmp.ne.s32.totalorder %v530_v31, 0  ;;  %vm500_vm13 = vcmp.ne.bf16.partialorder %v460_v22, 0  ;;  %vm501_vm14 = vcmp.ne.bf16.partialorder %v461_v26, 0 }
  0x5c   : > { %vm547_vm15 = vcmp.ne.s32.totalorder %v531_v32, 0  ;;  %v1281_v38 = vsel %vm1825_vm12, 1.0, %v1578_v7  ;;  %v831_v39 = vadd.f32 %v830_v29, %v816_v33  ;;  %1380 = vmatpush3.bf16.msra.mxu1 %v1308_v35  ;;  %v516_v40 = vsel %vm500_vm13, 65537, %v1579_v10 }
  0x5d   : > { %v1282_v42 = vsel %vm547_vm15, 1.0, %v1578_v7  ;;  %vm1297_vm0 = vmpackc.low %vm547_vm15, %vm1825_vm12  ;;  %v665_v43 = vadd.f32 %v1281_v38, %v664_v36  ;;  %v517_v44 = vsel %vm501_vm14, 65537, %v1579_v10  ;;  %v532_v45 = vunpack.c.l.b16 %v516_v40  ;;  %1381 = vmatprep.subr.bf16.mxu1 %v1578_v7  ;;  %v805_v40 = vld [vmem:[#allocation6] sm:$0x1] }
  0x5e   : > { %1360 = vmatpush3.bf16.msk.msra.mxu0 %vm1297_vm0, %v1580_v30  ;;  %v832_v47 = vadd.f32 %v831_v39, %v817_v34  ;;  %v533_v48 = vunpack.c.l.b16 %v517_v44  ;;  %v818_v49 = vunpack.c.l.bf16 %v460_v22  ;;  %v819_v50 = vunpack.c.l.bf16 %v461_v26  ;;  %v655_v44 = vld [vmem:[#allocation5] sm:$0x1] }
  0x5f   : > { %v666_v51 = vadd.f32 %v1282_v42, %v665_v43  ;;  %1361 = vmatprep.subr.bf16.mxu0 %v1578_v7  ;;  %vm548_vm1 = vcmp.ne.s32.totalorder %v532_v45, 0  ;;  %v1309_v52 = vcombine.low %v460_v22, %v461_v26  ;;  %vm502_vm2 = vcmp.ne.bf16.partialorder %v1834_v41, 0 }
  0x60   : > { %vm549_vm3 = vcmp.ne.s32.totalorder %v533_v48, 0  ;;  %v1283_v53 = vsel %vm548_vm1, 1.0, %v1578_v7  ;;  %v833_v54 = vadd.f32 %v832_v47, %v818_v49  ;;  %vm503_vm4 = vcmp.ne.bf16.partialorder %v463_v46, 0 }
  0x61   : > { %v1284_v56 = vsel %vm549_vm3, 1.0, %v1578_v7  ;;  %vm1299_vm5 = vmpackc.low %vm549_vm3, %vm548_vm1  ;;  %v667_v57 = vadd.f32 %v1283_v53, %v666_v51  ;;  %1382 = vmatpush3.bf16.msra.mxu1 %v1309_v52  ;;  %v518_v58 = vsel %vm502_vm2, 65537, %v1579_v10  ;;  %v519_v59 = vsel %vm503_vm4, 65537, %v1579_v10 }
  0x62   : > { %1362 = vmatpush3.bf16.msk.msra.mxu0 %vm1299_vm5, %v1580_v30  ;;  %v834_v60 = vadd.f32 %v833_v54, %v819_v50  ;;  %v534_v61 = vunpack.c.l.b16 %v518_v58  ;;  %v535_v62 = vunpack.c.l.b16 %v519_v59  ;;  %v820_v63 = vunpack.c.l.bf16 %v1834_v41  ;;  %1383 = vmatprep.subr.bf16.mxu1 %v1578_v7 }
  0x63   : > { %v668_v1 = vadd.f32 %v1284_v56, %v667_v57  ;;  %1363 = vmatprep.subr.bf16.mxu0 %v1578_v7  ;;  %v821_v2 = vunpack.c.l.bf16 %v463_v46  ;;  %v1857_v3 = vunpack.c.l.bf16 %v1324_v55  ;;  %vm1581_vm8 = vmmov 0  }
  0x64   : > { %vm550_vm6 = vcmp.ne.s32.totalorder %v534_v61, 0  ;;  %vm551_vm7 = vcmp.ne.s32.totalorder %v535_v62, 0  ;;  %v835_v10 = vadd.f32 %v834_v60, %v820_v63  ;;  %1365 = vmatprep.mubr.msk.bf16.mxu0 %vm1581_vm8, %v1578_v7  ;;  %v1860_v4 = vunpack.c.h.bf16 %v1324_v55  ;;  %1385 = vmatprep.mubr.msk.bf16.mxu1 %vm1581_vm8, %v1578_v7 }
  0x65   : > { %v1285_v5 = vsel %vm550_vm6, 1.0, %v1578_v7  ;;  %v1286_v6 = vsel %vm551_vm7, 1.0, %v1578_v7  ;;  %vm1301_vm9 = vmpackc.low %vm551_vm7, %vm550_vm6  ;;  %v1865_v8 = vunpack.c.l.bf16 %v1328_v0  ;;  %v1867_v9 = vunpack.c.h.bf16 %v1328_v0 }
  0x66   : > { %1364 = vmatpush3.bf16.msk.msra.mxu0 %vm1301_vm9, %v1580_v30  ;;  %v669_v11 = vadd.f32 %v1285_v5, %v668_v1  ;;  %v836_v12 = vadd.f32 %v835_v10, %v821_v2  ;;  %v1310_v13 = vcombine.low %v1834_v41, %v463_v46  ;;  %v468_v14 = vand.u32 2147483647, %v1857_v3 }
  0x67   : > { %v584_v15 = vmul.f32 %v1865_v8, %v1857_v3  ;;  %v585_v16 = vmul.f32 %v1867_v9, %v1860_v4  ;;  %vm679_vm10 = vcmp.gt.f32.partialorder %v1865_v8, 0.0  ;;  %vm680_vm11 = vcmp.gt.f32.partialorder %v1867_v9, 0.0 }
  0x68   : > { %v670_v7 = vadd.f32 %v1286_v6, %v669_v11  ;;  %v837_v17 = vrot.slane %v836_v12, 4  ;;  %v681_v30 = vsel %vm679_vm10, %v1857_v3, -1e+30  ;;  %v682_v18 = vsel %vm680_vm11, %v1860_v4, -1e+30  ;;  %1384 = vmatpush3.bf16.msra.mxu1 %v1310_v13 }
  0x69   : > { %v586_v19 = vsub.f32 0.0, %v584_v15  ;;  %v587_v20 = vsub.f32 0.0, %v585_v16  ;;  %v683_v21 = vmax.f32 %v681_v30, %v682_v18  ;;  %v470_v22 = vsub.f32 0.0, %v468_v14 }
  0x6a   : > { %v671_v23 = vrot.slane %v670_v7, 4  ;;  %v838_v24 = vadd.f32 %v837_v17, %v836_v12  ;;  %v469_v25 = vand.u32 2147483647, %v1860_v4  ;;  %v482_v59 = vmax.f32 %v1857_v3, 0.0 }
  0x6b   : > { %v588_v26 = vpack.c.bf16 %v587_v20, %v586_v19  ;;  %v684_v27 = vrot.slane %v683_v21, 4  ;;  %v472_v28 = vmul.f32 1.442695, %v470_v22  ;;  %v483_v1 = vmax.f32 %v1860_v4, 0.0  ;;  %v645_v22 = vld [vmem:[#allocation4 + $0x8] sm:$0xff] }
  0x6c   : > { %v672_v29 = vadd.f32 %v671_v23, %v670_v7  ;;  %v839_v31 = vrot.slane %v838_v24, 2  ;;  %v471_v32 = vsub.f32 0.0, %v469_v25  ;;  %vm652_vm13 = vcmask 7168  }
  0x6d   : > { %1366 = vmatmul.mubr.bf16.vlgmr.msra.gmra.mrb[0].mxu0 %v588_v26  ;;  %v685_v33 = vmax.f32 %v683_v21, %v684_v27  ;;  %1465 = vpow2.f32 %v472_v28  ;;  %v590_v26 = vld [vmem:[#allocation2 + $0x8] sm:$0xff]  ;;  %vm877_vm14 = vcmask (!%p1311_p13), 1040384  }
  0x6e   : > { %v673_v34 = vrot.slane %v672_v29, 2  ;;  %v840_v35 = vadd.f32 %v839_v31, %v838_v24  ;;  %v474_v36 = vmul.f32 1.442695, %v471_v32  ;;  %v589_v24 = vld [vmem:[#allocation2] sm:$0xff] }
  0x6f   : > { %v686_v37 = vrot.slane %v685_v33, 2 }
  0x70   : > { %v674_v38 = vadd.f32 %v673_v34, %v672_v29  ;;  %v841_v39 = vrot.slane %v840_v35, 1  ;;  %1467 = vpow2.f32 %v474_v36 }
  0x71   : > { %v687_v41 = vmax.f32 %v685_v33, %v686_v37  ;;  %v709_v33 = vld [vmem:[#allocation3] sm:$0xff] }
  0x72   : > { %v675_v42 = vrot.slane %v674_v38, 1  ;;  %v842_v43 = vadd.f32 %v841_v39, %v840_v35  ;;  %v710_v35 = vld [vmem:[#allocation3 + $0x8] sm:$0xff] }
  0x73   : > { %v688_v45 = vrot.slane %v687_v41, 1 }
  0x74   : > { %v676_v46 = vadd.f32 %v675_v42, %v674_v38  ;;  %v843_v47 = vadd.f32 %v842_v43, %v805_v40  ;;  %v872_v42 = vlaneseq (!%p1311_p13)  ;;  %v1891_v43 = vld [vmem:[%s1704_s28 + $0x8] sm:$0xff] (!%p1311_p13) }
  0x75   : > { %v689_v48 = vmax.f32 %v687_v41, %v688_v45  ;;  %v1887_v41 = vld [vmem:[%s1704_s28] sm:$0xff] (!%p1311_p13) }
  0x76   : > { %v677_v49 = vadd.f32 %v676_v46, %v655_v44  ;;  %844 = vst [vmem:[#allocation6] sm:$0x1] %v843_v47  ;;  %v873_v44 = vand.u32 (!%p1311_p13), 127, %v872_v42  ;;  %v1583_v46 = vmov (!%p1311_p13), 5   ;;  %v1584_v47 = vmov (!%p1311_p13), 3  }
  0x77   : > { %v1466_v50 = vpop.eup %1465  ;;  %vm690_vm12 = vcmp.gt.f32.partialorder %v689_v48, -1e+29  ;;  %1480 = vset.pattern.permute.xlu0 (!%p1311_p13), %v1583_v46  ;;  %1479 = vset.pattern.permute.xlu1 (!%p1311_p13), %v1584_v47 }
  0x78   : > { %678 = vst [vmem:[#allocation5] sm:$0x1] %v677_v49  ;;  %v691_v51 = vsel %vm690_vm12, %v689_v48, 0.0  ;;  %v476_v52 = vadd.f32 1.0, %v1466_v50  ;;  %vm874_vm15 = vcmp.lt.s32.totalorder (!%p1311_p13), %v873_v44, 8  ;;  %v1585_v50 = vmov (!%p1311_p13), 1  }
  0x79   : > { %v692_v53 = vsub.f32 %v681_v30, %v691_v51  ;;  %v693_v54 = vsub.f32 %v682_v18, %v691_v51  ;;  %v1586_v51 = vmov (!%p1311_p13), 2   ;;  %vm907_vm0 = vcmp.eq.s32.totalorder (!%p1311_p13), %v873_v44, 8 }
  0x7a   : > { %v1468_v55 = vpop.eup %1467  ;;  %1469 = vlog2.f32 %v476_v52  ;;  %v1587_v52 = vmov (!%p1311_p13), 4  }
  0x7b   : > { %v694_v56 = vmul.f32 1.442695, %v692_v53  ;;  %v696_v57 = vmul.f32 1.442695, %v693_v54  ;;  %v477_v58 = vadd.f32 1.0, %v1468_v55 }
  0x7d   : > { %1471 = vpow2.f32 %v694_v56 }
  0x7e   : > { %1473 = vpow2.f32 %v696_v57  ;;  %v856_v57 = vand.u32 (!%p1311_p13), 2147483647, %v1887_v41 }
  0x7f   : > { %1475 = vlog2.f32 %v477_v58  ;;  %v875_v45 = vld [vmem:[#allocation5] sm:$0x1] (!%p1311_p13) }
  0x80   : > { %v876_v48 = vsel (!%p1311_p13), %vm874_vm15, %v875_v45, 0.0  ;;  %v858_v58 = vsub.f32 (!%p1311_p13), 0.0, %v856_v57 }
  0x81   : > { %v878_v49 = vsel (!%p1311_p13), %vm877_vm14, %v876_v48, 0.0 }
  0x82   : > { %879 = vadd.xlane.f32.xlu1 (!%p1311_p13), %v878_v49 }
  0x84   : > { %v1470_v60 = vpop.eup %1469 }
  0x85   : > { %v479_v61 = vmul.f32 0.6931472, %v1470_v60  ;;  %v860_v60 = vmul.f32 (!%p1311_p13), 1.442695, %v858_v58 }
  0x87   : > { %v1472_v62 = vpop.eup %1471  ;;  %v484_v63 = vadd.f32 %v482_v59, %v479_v61  ;;  %v857_v59 = vand.u32 (!%p1311_p13), 2147483647, %v1891_v43 }
  0x88   : > { %v1474_v0 = vpop.eup %1473 }
  0x89   : > { %v1476_v2 = vpop.eup %1475  ;;  %v698_v10 = vadd.f32 %v1474_v0, %v1472_v62  ;;  %v486_v5 = vmul.f32 %v1865_v8, %v484_v63  ;;  %v644_v8 = vld [vmem:[#allocation4] sm:$0xff]  ;;  %v859_v61 = vsub.f32 (!%p1311_p13), 0.0, %v857_v59 }
  0x8a   : > { %v481_v6 = vmul.f32 0.6931472, %v1476_v2 }
  0x8b   : > { %v699_v11 = vrot.slane %v698_v10, 4  ;;  %646 = vadd.xlane.f32.xlu0 %v486_v5 }
  0x8c   : > { %v485_v12 = vadd.f32 %v483_v1, %v481_v6 }
  0x8d   : > { %v700_v13 = vadd.f32 %v699_v11, %v698_v10 }
  0x8e   : > { %v487_v14 = vmul.f32 %v1867_v9, %v485_v12 }
  0x8f   : > { %v701_v15 = vrot.slane %v700_v13, 2 }
  0x90   : > { %648 = vadd.xlane.f32.xlu0 %v487_v14 }
  0x91   : > { %v702_v3 = vadd.f32 %v701_v15, %v700_v13 }
  0x93   : > { %v703_v16 = vrot.slane %v702_v3, 1  ;;  %1010 = vperm.xlu1 (!%p1311_p13), %1479, %v1887_v41  }
  0x95   : > { %v704_v7 = vadd.f32 %v703_v16, %v702_v3  ;;  %v1588_v3 = vmov (!%p1311_p13), 0   ;;  %v852_v16 = vsub.f32 (!%p1311_p13), 0.0, %v1887_v41 }
  0x97   : > { %v705_v17 = vadd.f32 1e-20, %v704_v7  ;;  %1481 = vset.pattern.permute.xlu1 (!%p1311_p13), %v1583_v46 }
  0x98   : > { %1038 = vperm.xlu1 (!%p1311_p13), %1481, %v1891_v43  }
  0x99   : > { %1477 = vrcp.f32 %v705_v17 }
  0x9a   : > { %1491 = vpow2.f32 (!%p1311_p13), %v860_v60 }
  0x9c   : > { %1483 = vset.pattern.permute.xlu1 (!%p1311_p13), %v1585_v50 }
  0x9d   : > { %942 = vperm.xlu1 (!%p1311_p13), %1483, %v1891_v43  }
  0xa1   : > { %1484 = vset.pattern.permute.xlu1 (!%p1311_p13), %v1586_v51 }
  0xa2   : > { %952 = vperm.xlu1 (!%p1311_p13), %1484, %v1887_v41  }
  0xa3   : > { %v1478_v30 = vpop.eup %1477 }
  0xa4   : > { %v707_v4 = vmul.f32 %v1478_v30, %v1472_v62  ;;  %v708_v18 = vmul.f32 %v1478_v30, %v1474_v0  ;;  %v862_v62 = vmul.f32 (!%p1311_p13), 1.442695, %v859_v61  ;;  %v1492_v2 = vpop.eup (!%p1311_p13), %1491  ;;  %v854_v30 = vmax.f32 (!%p1311_p13), %v852_v16, 0.0 }
  0xa5   : > { %v864_v5 = vadd.f32 (!%p1311_p13), 1.0, %v1492_v2  ;;  %v1312_v2 = vld [vmem:[#allocation6] ss:$0 sm:$0xff] (!%p1311_p13) }
  0xa6   : > { %v711_v19 = vpack.c.bf16 %v708_v18, %v707_v4  ;;  %1053 = vrot.lane.b32.xlu0 (!%p1311_p13), %v1887_v41, %s1582_s0  ;;  %1487 = vset.pattern.permute.xlu1 (!%p1311_p13), %v1587_v52  ;;  %1493 = vpow2.f32 (!%p1311_p13), %v862_v62  ;;  %v853_v18 = vsub.f32 (!%p1311_p13), 0.0, %v1891_v43 }
  0xa7   : > { %1022 = vperm.xlu1 (!%p1311_p13), %1487, %v1887_v41  }
  0xa8   : > { %1386 = vmatmul.mubr.bf16.vlgmr.msra.gmra.mrb[0].mxu1 %v711_v19 }
  0xaa   : > { %1055 = vrot.lane.b32.xlu0 (!%p1311_p13), %v1891_v43, %s1582_s0 }
  0xab   : > { %1026 = vperm.xlu1 (!%p1311_p13), %1487, %v1891_v43  }
  0xae   : > { %1034 = vperm.xlu0 (!%p1311_p13), %1480, %v1887_v41  }
  0xaf   : > { %1488 = vset.pattern.permute.xlu1 (!%p1311_p13), %v1584_v47 }
  0xb0   : > { %v1494_v6 = vpop.eup (!%p1311_p13), %1493 }
  0xb1   : > { %v865_v11 = vadd.f32 (!%p1311_p13), 1.0, %v1494_v6 }
  0xb2   : > { %1482 = vset.pattern.permute.xlu0 (!%p1311_p13), %v1585_v50 }
  0xb3   : > { %937 = vperm.xlu0 (!%p1311_p13), %1482, %v1887_v41  }
  0xb7   : > { %1485 = vset.pattern.permute.xlu0 (!%p1311_p13), %v1586_v51 }
  0xb8   : > { %956 = vperm.xlu0 (!%p1311_p13), %1485, %v1891_v43  }
  0xbc   : > { %1486 = vset.pattern.permute.xlu0 (!%p1311_p13), %v1584_v47 }
  0xbd   : > { %1014 = vperm.xlu0 (!%p1311_p13), %1486, %v1891_v43  }
 0x118   : > { %v647_v20 = vpop.xlane.xlu0 %646 }
 0x119   : > { %v650_v21 = vadd.f32 %v647_v20, %v644_v8 }
 0x11b   : > { %653 = vst.msk [vmem:[#allocation4] sm:$0xff] %vm652_vm13, %v650_v21  ;;  %v855_v21 = vmax.f32 (!%p1311_p13), %v853_v18, 0.0 }
 0x11d   : > { %v649_v23 = vpop.xlane.xlu0 %648 }
 0x11e   : > { %v651_v9 = vadd.f32 %v649_v23, %v645_v22 }
 0x120   : > { %654 = vst.msk [vmem:[#allocation4 + $0x8] sm:$0xff] %vm652_vm13, %v651_v9  ;;  %v880_v9 = vpop.xlane.xlu1 (!%p1311_p13), %879 }
 0x121   : > { %v1054_v63 = vpop.permute.xlu0 (!%p1311_p13), %1053 }
 0x122   : > { %v1059_v0 = vmul.f32 (!%p1311_p13), %v1054_v63, %v1887_v41  ;;  %v884_v17 = vld [vmem:[#allocation4] sm:$0xff] (!%p1311_p13) }
 0x124   : > { %1495 = vlog2.f32 (!%p1311_p13), %v1059_v0 }
 0x125   : > { %v1056_v1 = vpop.permute.xlu0 (!%p1311_p13), %1055 }
 0x126   : > { %v1060_v10 = vmul.f32 (!%p1311_p13), %v1056_v1, %v1891_v43 }
 0x127   : > { %v885_v8 = vld [vmem:[#allocation4 + $0x8] sm:$0xff] (!%p1311_p13) }
 0x128   : > { %1497 = vlog2.f32 (!%p1311_p13), %v1060_v10 }
 0x129   : > { %1499 = vlog2.f32 (!%p1311_p13), %v864_v5 }
 0x12a   : > { %1501 = vlog2.f32 (!%p1311_p13), %v865_v11 }
 0x12e   : > { %v1496_v12 = vpop.eup (!%p1311_p13), %1495 }
 0x12f   : > { %v1062_v13 = vmul.f32 (!%p1311_p13), 0.6931472, %v1496_v12 }
 0x132   : > { %v1498_v14 = vpop.eup (!%p1311_p13), %1497 }
 0x133   : > { %v1064_v15 = vmul.f32 (!%p1311_p13), 0.6931472, %v1498_v14  ;;  %v1500_v7 = vpop.eup (!%p1311_p13), %1499  ;;  %v881_v14 = vmax.f32 (!%p1311_p13), %v880_v9, 1.0 }
 0x134   : > { %v867_v4 = vmul.f32 (!%p1311_p13), 0.6931472, %v1500_v7  ;;  %v1502_v19 = vpop.eup (!%p1311_p13), %1501 }
 0x135   : > { %v869_v22 = vmul.f32 (!%p1311_p13), 0.6931472, %v1502_v19 }
 0x136   : > { %v870_v20 = vadd.f32 (!%p1311_p13), %v867_v4, %v854_v30 }
 0x137   : > { %v871_v23 = vadd.f32 (!%p1311_p13), %v869_v22, %v855_v21 }
 0x140   : > { %v633_v25 = vpop.f32.mrb[0].mxu0 }
 0x141   : > { %v640_v27 = vadd.f32 %v633_v25, %v589_v24  ;;  %v1367_v28 = vpop.f32.mrb[1].mxu0  ;;  %v1035_v24 = vpop.permute.xlu0 (!%p1311_p13), %1034 }
 0x142   : > { %v636_v29 = vpop.f32.mrb[2].mxu0  ;;  %v1011_v25 = vpop.permute.xlu1 (!%p1311_p13), %1010 }
 0x143   : > { %642 = vst [vmem:[#allocation2] sm:$0xff] %v640_v27  ;;  %v641_v31 = vadd.f32 %v636_v29, %v590_v26  ;;  %v1368_v32 = vpop.f32.mrb[3].mxu0  ;;  %v899_v27 = vshrl.u32 (!%p1311_p13), %v872_v42, 7  ;;  %1503 = vrcp.f32 (!%p1311_p13), %v1011_v25 }
 0x144   : > { %v851_v32 = vld [vmem:[%s1709_s8] sm:$0xf] (!%p1311_p13) }
 0x145   : > { %643 = vst [vmem:[#allocation2 + $0x8] sm:$0xff] %v641_v31  ;;  %v938_v26 = vpop.permute.xlu0 (!%p1311_p13), %937  ;;  %v900_v31 = vsub.s32 (!%p1311_p13), 0, %v899_v27  ;;  %v1005_v44 = vsub.s32 (!%p1311_p13), 3, %v899_v27 }
 0x146   : > { %v1039_v28 = vpop.permute.xlu1 (!%p1311_p13), %1038 }
 0x147   : > { %v1006_v47 = vrot.slane (!%p1311_p13), %v851_v32, %v1005_v44  ;;  %v901_v30 = vrot.slane (!%p1311_p13), %v881_v14, %v900_v31 }
 0x149   : > { %v957_v29 = vpop.permute.xlu0 (!%p1311_p13), %956 }
 0x14d   : > { %v1504_v46 = vpop.eup (!%p1311_p13), %1503 }
 0x17a   : > { %848 = sbr.rel (%p1311_p13) target bundleno = 566 (0x236), region = 130 }
 0x17b   : > { %v794_v34 = vpop.f32.mrb[0].mxu1 }
 0x17c   : > { %v801_v36 = vadd.f32 %v794_v34, %v709_v33  ;;  %v1387_v37 = vpop.f32.mrb[1].mxu1  ;;  %v943_v33 = vpop.permute.xlu1 (!%p1311_p13), %942  ;;  %v948_v34 = vrot.slane (!%p1311_p13), %v851_v32, %v900_v31 }
 0x17d   : > { %v797_v38 = vpop.f32.mrb[2].mxu1 }
 0x17e   : > { %803 = vst [vmem:[#allocation3] sm:$0xff] %v801_v36  ;;  %v802_v39 = vadd.f32 %v797_v38, %v710_v35  ;;  %v1388_v40 = vpop.f32.mrb[3].mxu1  ;;  %v997_v35 = vsub.s32 (!%p1311_p13), 2, %v899_v27  ;;  %v1015_v36 = vpop.permute.xlu0 (!%p1311_p13), %1014  ;;  %v993_v38 = vsub.f32 (!%p1311_p13), %v948_v34, %v938_v26  ;;  %v994_v45 = vsub.f32 (!%p1311_p13), %v948_v34, %v943_v33 }
 0x17f   : > { %1505 = vrcp.f32 (!%p1311_p13), %v1015_v36  ;;  %v949_v19 = vsub.f32 (!%p1311_p13), %v938_v26, %v948_v34 }
 0x180   : > { %804 = vst [vmem:[#allocation3 + $0x8] sm:$0xff] %v802_v39  ;;  %v998_v37 = vrot.slane (!%p1311_p13), %v851_v32, %v997_v35  ;;  %v961_v39 = vsub.s32 (!%p1311_p13), 1, %v899_v27  ;;  %v953_v40 = vpop.permute.xlu1 (!%p1311_p13), %952  ;;  %1507 = vrcp.f32 (!%p1311_p13), %v1035_v24  ;;  %v950_v24 = vsub.f32 (!%p1311_p13), %v943_v33, %v948_v34 }
 0x181   : > { %1509 = vrcp.f32 %v1039_v28  ;;  %v965_v28 = vand.u32 2147483647, %v949_v19 }
 0x182   : > { %v999_v41 = vmul.f32 %v998_v37, %v993_v38  ;;  %v962_v43 = vrot.slane %v851_v32, %v961_v39  ;;  %v1000_v48 = vmul.f32 %v998_v37, %v994_v45  ;;  %v969_v32 = vmul.f32 0.5, %v949_v19 }
 0x183   : > { %v1313_v44 = vadd.f32 -0.5, %v965_v28  ;;  %vm1924_vm1 = vcmp.lt.f32.partialorder %v965_v28, 1.0 }
 0x184   : > { %v1023_v42 = vpop.permute.xlu1 %1022  ;;  %v1001_v49 = vsub.f32 %v962_v43, %v953_v40  ;;  %v1018_v50 = vmul.f32 %v1504_v46, %v999_v41  ;;  %v1002_v52 = vsub.f32 %v962_v43, %v957_v29  ;;  %v963_v21 = vsub.f32 %v953_v40, %v962_v43 }
 0x185   : > { %v1905_v53 = vld [vmem:[#allocation3] sm:$0xff]  ;;  %v966_v40 = vand.u32 2147483647, %v950_v24 }
 0x186   : > { %v908_v54 = vsel %vm907_vm0, %v1905_v53, 0.0  ;;  %v1008_v59 = vmul.f32 %v1006_v47, %v1002_v52  ;;  %v1045_v5 = vmul.f32 %v1018_v50, %v1018_v50  ;;  %v925_v27 = vmul.f32 2.0, %v1905_v53 }
 0x187   : > { %910 = vadd.xlane.f32.xlu0 %v908_v54  ;;  %v1908_v55 = vld [vmem:[#allocation3 + $0x8] sm:$0xff]  ;;  %v1007_v54 = vmul.f32 %v1006_v47, %v1001_v49  ;;  %v977_v35 = vand.u32 2147483647, %v963_v21  ;;  %v981_v36 = vmul.f32 0.5, %v963_v21  ;;  %v882_v47 = vld [vmem:[#allocation2] sm:$0xff]  ;;  %vm1936_vm4 = vcmp.lt.f32.partialorder %v966_v40, 1.0 }
 0x188   : > { %v909_v56 = vsel %vm907_vm0, %v1908_v55, 0.0  ;;  %v1027_v58 = vpop.permute.xlu1 %1026  ;;  %v927_v34 = vadd.f32 1.0, %v925_v27  ;;  %v926_v41 = vmul.f32 2.0, %v1908_v55  ;;  %v1314_v55 = vadd.f32 -0.5, %v966_v40 }
 0x189   : > { %912 = vadd.xlane.f32.xlu1 %v909_v56  ;;  %v1506_v51 = vpop.eup %1505  ;;  %v1029_v56 = vmul.f32 %v1023_v42, %v1018_v50  ;;  %v983_v45 = vmul.f32 %v981_v36, %v963_v21  ;;  %v1315_v46 = vadd.f32 -0.5, %v977_v35  ;;  %vm1928_vm2 = vcmp.lt.f32.partialorder %v977_v35, 1.0 }
 0x18a   : > { %v1020_v57 = vmul.f32 %v1506_v51, %v1000_v48  ;;  %v1508_v62 = vpop.eup %1507 }
 0x18b   : > { %v1031_v60 = vsub.f32 %v1007_v54, %v1029_v56  ;;  %v1510_v1 = vpop.eup %1509 }
 0x18c   : > { %v1030_v61 = vmul.f32 %v1027_v58, %v1020_v57 }
 0x18d   : > { %v1042_v63 = vmul.f32 %v1508_v62, %v1031_v60  ;;  %v883_v62 = vld [vmem:[#allocation2 + $0x8] sm:$0xff] }
 0x18e   : > { %v1032_v0 = vsub.f32 %v1008_v59, %v1030_v61  ;;  %v928_v61 = vadd.f32 1.0, %v926_v41 }
 0x18f   : > { %v1047_v12 = vmul.f32 %v1042_v63, %v1042_v63 }
 0x190   : > { %v1044_v6 = vmul.f32 %v1510_v1, %v1032_v0  ;;  %v987_v1 = vsel %vm1928_vm2, %v983_v45, %v1315_v46 }
 0x191   : > { %v1049_v16 = vadd.f32 %v1047_v12, %v1045_v5 }
 0x192   : > { %v1048_v7 = vmul.f32 %v1044_v6, %v1044_v6 }
 0x193   : > { %v1051_v4 = vmul.f32 -0.5, %v1049_v16 }
 0x19a   : > { %1072 = vperm.xlu1 %1488, %v1064_v15   ;;  %v1046_v15 = vmul.f32 %v1020_v57, %v1020_v57 }
 0x19c   : > { %v1050_v18 = vadd.f32 %v1048_v7, %v1046_v15 }
 0x19d   : > { %1067 = vperm.xlu0 %1486, %v1062_v13  }
 0x19e   : > { %1489 = vset.pattern.permute.xlu1 %v1588_v3  ;;  %v1052_v9 = vmul.f32 -0.5, %v1050_v18 }
 0x19f   : > { %888 = vperm.xlu1 %1489, %v884_v17  }
 0x1a1   : > { %1490 = vset.pattern.permute.xlu0 %v1588_v3 }
 0x1a3   : > { %893 = vperm.xlu1 %1489, %v885_v8  }
 0x1a7   : > { %1089 = vperm.xlu1 %1489, %v870_v20  }
 0x1ab   : > { %1094 = vperm.xlu1 %1489, %v871_v23   ;;  %v964_v23 = vsub.f32 %v957_v29, %v962_v43  ;;  %v970_v29 = vmul.f32 0.5, %v950_v24  ;;  %v971_v43 = vmul.f32 %v969_v32, %v949_v19 }
 0x1ad   : > { %v978_v38 = vand.u32 2147483647, %v964_v23  ;;  %v982_v39 = vmul.f32 0.5, %v964_v23  ;;  %v972_v54 = vmul.f32 %v970_v29, %v950_v24  ;;  %v975_v0 = vsel %vm1924_vm1, %v971_v43, %v1313_v44 }
 0x1af   : > { %v984_v50 = vmul.f32 %v982_v39, %v964_v23  ;;  %v1316_v52 = vadd.f32 -0.5, %v978_v38  ;;  %vm1932_vm3 = vcmp.lt.f32.partialorder %v978_v38, 1.0 }
 0x1b1   : > { %v988_v5 = vsel %vm1932_vm3, %v984_v50, %v1316_v52 }
 0x214   : > { %v911_v10 = vpop.xlane.xlu0 %910 }
 0x215   : > { %v921_v11 = vadd.f32 %v1312_v2, %v911_v10  ;;  %v976_v10 = vsel %vm1936_vm4, %v972_v54, %v1314_v55 }
 0x216   : > { %v913_v13 = vpop.xlane.xlu1 %912 }
 0x217   : > { %v923_v3 = vadd.f32 1.0, %v921_v11  ;;  %v922_v17 = vadd.f32 %v1312_v2, %v913_v13  ;;  %v989_v13 = vadd.f32 %v987_v1, %v975_v0 }
 0x219   : > { %1511 = vrcp.f32 %v923_v3  ;;  %v924_v8 = vadd.f32 1.0, %v922_v17  ;;  %v990_v17 = vadd.f32 %v988_v5, %v976_v10 }
 0x21a   : > { %1513 = vrcp.f32 %v901_v30  ;;  %v1073_v31 = vpop.permute.xlu1 %1072 }
 0x21b   : > { %1515 = vrcp.f32 %v924_v8  ;;  %v1076_v37 = vsub.f32 %v1052_v9, %v1073_v31  ;;  %v992_v27 = vmul.f32 0.5, %v990_v17 }
 0x21c   : > { %v1068_v20 = vpop.permute.xlu0 %1067 }
 0x21d   : > { %v1075_v22 = vsub.f32 %v1051_v4, %v1068_v20  ;;  %v1318_v33 = vadd.f32 -1.837877, %v1076_v37  ;;  %v991_v4 = vmul.f32 0.5, %v989_v13 }
 0x21e   : > { %v889_v48 = vpop.permute.xlu1 %888 }
 0x21f   : > { %v1919_v25 = vadd.f32 -1.837877, %v1075_v22  ;;  %v1083_v42 = vmul.f32 1.442695, %v1318_v33  ;;  %v896_v58 = vadd.f32 %v889_v48, %v882_v47  ;;  %v1080_v23 = vsub.f32 0.0, %v1318_v33 }
 0x221   : > { %v1081_v26 = vmul.f32 1.442695, %v1919_v25  ;;  %v1079_v16 = vsub.f32 0.0, %v1919_v25  ;;  %v1104_v35 = vmul.f32 0.5, %v1080_v23 }
 0x222   : > { %v894_v63 = vpop.permute.xlu1 %893 }
 0x223   : > { %1517 = vpow2.f32 %v1081_v26  ;;  %v1512_v53 = vpop.eup %1511  ;;  %v897_v6 = vadd.f32 %v894_v63, %v883_v62  ;;  %v1103_v22 = vmul.f32 0.5, %v1079_v16 }
 0x224   : > { %1519 = vpow2.f32 %v1083_v42  ;;  %v930_v59 = vmul.f32 %v1512_v53, %v927_v34  ;;  %v1514_v60 = vpop.eup %1513 }
 0x225   : > { %v1516_v2 = vpop.eup %1515  ;;  %v903_v11 = vmul.f32 %v1514_v60, %v896_v58  ;;  %v904_v19 = vmul.f32 %v1514_v60, %v897_v6 }
 0x226   : > { %v933_v12 = vsub.f32 1.0, %v930_v59  ;;  %v1090_v15 = vpop.permute.xlu1 %1089  ;;  %v932_v3 = vmul.f32 %v1516_v2, %v928_v61 }
 0x227   : > { %v1097_v7 = vadd.f32 %v1090_v15, %v903_v11 }
 0x228   : > { %v934_v20 = vsub.f32 1.0, %v932_v3 }
 0x229   : > { %v1099_v18 = vadd.f32 %v1097_v7, %v933_v12 }
 0x22a   : > { %v1095_v21 = vpop.permute.xlu1 %1094 }
 0x22b   : > { %v1101_v24 = vadd.f32 %v1099_v18, %v991_v4  ;;  %v1098_v9 = vadd.f32 %v1095_v21, %v904_v19 }
 0x22d   : > { %v1518_v14 = vpop.eup %1517  ;;  %v1105_v31 = vadd.f32 %v1103_v22, %v1101_v24  ;;  %v1100_v25 = vadd.f32 %v1098_v9, %v934_v20 }
 0x22e   : > { %v1085_v30 = vsub.f32 1.0, %v1518_v14  ;;  %v1520_v8 = vpop.eup %1519 }
 0x22f   : > { %v1086_v32 = vsub.f32 1.0, %v1520_v8  ;;  %v1102_v26 = vadd.f32 %v1100_v25, %v992_v27 }
 0x230   : > { %v1107_v28 = vmul.f32 0.5, %v1085_v30 }
 0x231   : > { %v1108_v37 = vmul.f32 0.5, %v1086_v32  ;;  %v1106_v38 = vadd.f32 %v1104_v35, %v1102_v26 }
 0x232   : > { %v1109_v36 = vadd.f32 %v1107_v28, %v1105_v31 }
 0x233   : > { %v1110_v39 = vadd.f32 %v1108_v37, %v1106_v38 }
 0x234   : > { %1111 = vst [vmem:[%s1714_s27] sm:$0xff] %v1109_v36 }
 0x235   : > { %1112 = vst [vmem:[%s1714_s27 + $0x8] sm:$0xff] %v1110_v39 }
 0x236 PF: > { %s15_s24 = sadd.s32 1, %s1575_s24   ;;  %s2007_s1 = sld [smem:[#allocation9_spill]] }
 0x237   : > { %p12_p0 = scmp.ge.s32.totalorder %s15_s24, 6   ;;  %s2008_s18 = smov %s1555_s19 }
 0x238   : > { %s2009_s19 = smov %s1674_s7  ;;  %s2010_s20 = smov %s1567_s22 }
 0x239   : > { %s2011_s21 = smov %s1571_s23  ;;  %s2012_s22 = smov %s2015_s25 }
 0x23a   :  { %14 = sbr.rel (!%p12_p0) target bundleno = 7 (0x7), region = 182 }
 0x23c   : > { %s2013_s23 = smov %s2007_s1 }

</bundles_post_ra>
